<compile_context>
chip_gen: v7x
topology: tpu7x:2x2x1
jax: 0.10.0
libtpu: 0.0.40
codegen_flags: <defaults>
</compile_context>

<pallas_src>
import numpy as np
import jax
import jax.numpy as jnp
from jax.experimental import pallas as pl
from jax.experimental.pallas import tpu as pltpu

_LANES = 128
_SUBLANES = 8


def _make_topk_mean_kernel(total, k, rows):
    """Build the fused |p-t| -> exact top-k-mean kernel (all sizes static)."""
    inv_k = 1.0 / float(k)

    def kernel(p_ref, t_ref, o_ref):
        p = p_ref[...].astype(jnp.float32)
        t = t_ref[...].astype(jnp.float32)
        d = jnp.abs(p - t)                                     # (rows, 128)

        # Mask out the zero-padded tail so it can never enter the top-k.
        row = jax.lax.broadcasted_iota(jnp.int32, (rows, _LANES), 0)
        col = jax.lax.broadcasted_iota(jnp.int32, (rows, _LANES), 1)
        valid = (row * _LANES + col) < total

        # Non-negative f32 values order exactly like their int32 bit patterns.
        bits = pltpu.bitcast(d, jnp.int32)
        bits = jnp.where(valid, bits, jnp.int32(-1))

        # MSB-first radix select of the k-th largest bit pattern.  Bit 31 is
        # the sign bit and is always 0 for |.| values, so start at bit 30.
        # Unrolled: 31 full-width compare + reduce passes (tiny tile, all VMEM).
        prefix = jnp.int32(0)
        for b in range(30, -1, -1):
            cand = prefix | (1 << b)
            cnt = jnp.sum((bits >= cand).astype(jnp.int32))
            prefix = jnp.where(cnt >= k, cand, prefix)
        thr_bits = prefix                                      # k-th largest value (bits)

        gt = bits > thr_bits
        cnt_gt = jnp.sum(gt.astype(jnp.int32))
        sum_gt = jnp.sum(jnp.where(gt, d, 0.0))
        # The threshold value itself (>= 0); at least one element matches it.
        thr_val = jnp.max(jnp.where(bits == thr_bits, d, 0.0))
        loss = (sum_gt + (k - cnt_gt).astype(jnp.float32) * thr_val) * inv_k

        # Lane-dense output row; the wrapper reads [0, 0].
        o_ref[...] = jnp.zeros((1, _LANES), jnp.float32) + loss

    return kernel


def topk_reg_loss(preds, targets, topK, size_average=True):
    """Forward of topK_RegLoss: mean of the top-(topK fraction) |preds - targets|."""
    del size_average  # the torch forward uses torch.mean(V) unconditionally
    assert preds.shape == targets.shape, "dim of preds and targets are different"
    shape = preds.shape
    total = int(np.prod(shape))
    if len(shape) == 4:
        k = int(shape[0] * shape[1] * shape[2] * shape[3] * topK)
    else:
        k = int(shape[0] * shape[1] * shape[2] * topK)
    assert 1 <= k <= total, "topK fraction must select at least one element"

    # Flatten + pad to a lane-dense (rows, 128) layout, rows a multiple of 8.
    block = _LANES * _SUBLANES
    padded = ((total + block - 1) // block) * block
    pad = padded - total
    p_flat = preds.reshape(-1).astype(jnp.float32)
    t_flat = targets.reshape(-1).astype(jnp.float32)
    if pad:
        p_flat = jnp.pad(p_flat, (0, pad))
        t_flat = jnp.pad(t_flat, (0, pad))
    rows = padded // _LANES
    p2d = p_flat.reshape(rows, _LANES)
    t2d = t_flat.reshape(rows, _LANES)

    out = pl.pallas_call(
        _make_topk_mean_kernel(total, k, rows),
        out_shape=jax.ShapeDtypeStruct((1, _LANES), jnp.float32),
        grid_spec=pltpu.PrefetchScalarGridSpec(
            num_scalar_prefetch=0,
            grid=(1,),
            in_specs=[
                pl.BlockSpec((rows, _LANES), lambda i: (0, 0)),
                pl.BlockSpec((rows, _LANES), lambda i: (0, 0)),
            ],
            out_specs=pl.BlockSpec((1, _LANES), lambda i: (0, 0)),
        ),
        compiler_params=pltpu.CompilerParams(
            dimension_semantics=("arbitrary",)),
        cost_estimate=pl.CostEstimate(
            flops=70 * padded,
            transcendentals=0,
            bytes_accessed=2 * padded * 4 + _LANES * 4),
    )(p2d, t2d)
    return out[0, 0]


class TopKRegLoss:
    """Thin API-parity wrapper mirroring the PyTorch module."""

    def __init__(self, topK, size_average=True):
        self.topK = topK
        self.size_average = size_average

    def __call__(self, preds, targets):
        return topk_reg_loss(preds, targets, self.topK, self.size_average)


if __name__ == "__main__":
    # Small shapes consistent with the 4-D (n, h, w, d) forward path.
    N, H, W, D = 2, 4, 16, 16
    topK_frac = 0.25

    key = jax.random.PRNGKey(0)
    kp, kt = jax.random.split(key)
    preds = jax.random.normal(kp, (N, H, W, D), jnp.float32)
    targets = jax.random.normal(kt, (N, H, W, D), jnp.float32)

    loss_fn = jax.jit(lambda p, t: topk_reg_loss(p, t, topK_frac))
    loss = jax.block_until_ready(loss_fn(preds, targets))

    # Pure-JAX reference with torch.topk + mean semantics.
    k = int(N * H * W * D * topK_frac)
    ref = jnp.mean(jax.lax.top_k(jnp.abs(preds - targets).reshape(-1), k)[0])
    np.testing.assert_allclose(np.asarray(loss), np.asarray(ref),
                               rtol=1e-5, atol=1e-6)

    assert loss.shape == ()
    print("KERNEL_OK")
</pallas_src>

<mosaic_0001>
module attributes {stable_mosaic.version = 11 : i64} {
  func.func @kernel(%arg0: i32, %arg1: memref<16x128xf32, #tpu.memory_space<vmem>>, %arg2: memref<16x128xf32, #tpu.memory_space<vmem>>, %arg3: memref<1x128xf32, #tpu.memory_space<vmem>>) attributes {dimension_semantics = [#tpu.dimension_semantics<arbitrary>], iteration_bounds = array<i64: 1>, scalar_prefetch = 0 : i64, scratch_operands = 0 : i64, tpu.core_type = #tpu.core_type<tc>, window_params = [{pipeline_mode = #tpu.pipeline_mode<synchronous>, transform_indices = @transform_0, window_bounds = array<i64: 16, 128>}, {pipeline_mode = #tpu.pipeline_mode<synchronous>, transform_indices = @transform_1, window_bounds = array<i64: 16, 128>}, {pipeline_mode = #tpu.pipeline_mode<synchronous>, transform_indices = @transform_2, window_bounds = array<i64: 1, 128>}]} {
    %c0 = arith.constant 0 : index
    %c0_0 = arith.constant 0 : index
    %0 = vector.load %arg1[%c0, %c0_0] : memref<16x128xf32, #tpu.memory_space<vmem>>, vector<16x128xf32>
    %c0_1 = arith.constant 0 : index
    %c0_2 = arith.constant 0 : index
    %1 = vector.load %arg2[%c0_1, %c0_2] : memref<16x128xf32, #tpu.memory_space<vmem>>, vector<16x128xf32>
    %2 = arith.subf %0, %1 : vector<16x128xf32>
    %3 = math.absf %2 : vector<16x128xf32>
    %4 = tpu.iota {dimensions = array<i32: 0>} : vector<16x128xi32>
    %5 = tpu.iota {dimensions = array<i32: 1>} : vector<16x128xi32>
    %c128_i32 = arith.constant 128 : i32
    %6 = vector.broadcast %c128_i32 : i32 to vector<16x128xi32>
    %7 = arith.muli %4, %6 : vector<16x128xi32>
    %8 = arith.addi %7, %5 : vector<16x128xi32>
    %c2048_i32 = arith.constant 2048 : i32
    %9 = vector.broadcast %c2048_i32 : i32 to vector<16x128xi32>
    %10 = arith.cmpi slt, %8, %9 : vector<16x128xi32>
    %11 = tpu.bitcast %3 : vector<16x128xf32> -> vector<16x128xi32>
    %c-1_i32 = arith.constant -1 : i32
    %12 = vector.broadcast %c-1_i32 : i32 to vector<16x128xi32>
    %13 = arith.select %10, %11, %12 : vector<16x128xi1>, vector<16x128xi32>
    %c0_i32 = arith.constant 0 : i32
    %c1073741824_i32 = arith.constant 1073741824 : i32
    %14 = arith.ori %c0_i32, %c1073741824_i32 : i32
    %15 = vector.broadcast %14 : i32 to vector<16x128xi32>
    %16 = arith.cmpi sge, %13, %15 : vector<16x128xi32>
    %17 = arith.extui %16 : vector<16x128xi1> to vector<16x128xi32>
    %18 = vector.shape_cast %17 : vector<16x128xi32> to vector<1x16x128xi32>
    %cst = arith.constant dense<0> : vector<1xi32>
    %19 = vector.multi_reduction <add>, %18, %cst [1, 2] : vector<1x16x128xi32> to vector<1xi32>
    %20 = vector.shape_cast %19 : vector<1xi32> to vector<1x1x1xi32>
    %21 = vector.extract %20[0, 0, 0] : i32 from vector<1x1x1xi32>
    %c512_i32 = arith.constant 512 : i32
    %22 = arith.cmpi sge, %21, %c512_i32 : i32
    %c0_i32_3 = arith.constant 0 : i32
    %23 = arith.select %22, %14, %c0_i32_3 : i32
    %c536870912_i32 = arith.constant 536870912 : i32
    %24 = arith.ori %23, %c536870912_i32 : i32
    %25 = vector.broadcast %24 : i32 to vector<16x128xi32>
    %26 = arith.cmpi sge, %13, %25 : vector<16x128xi32>
    %27 = arith.extui %26 : vector<16x128xi1> to vector<16x128xi32>
    %28 = vector.shape_cast %27 : vector<16x128xi32> to vector<1x16x128xi32>
    %cst_4 = arith.constant dense<0> : vector<1xi32>
    %29 = vector.multi_reduction <add>, %28, %cst_4 [1, 2] : vector<1x16x128xi32> to vector<1xi32>
    %30 = vector.shape_cast %29 : vector<1xi32> to vector<1x1x1xi32>
    %31 = vector.extract %30[0, 0, 0] : i32 from vector<1x1x1xi32>
    %c512_i32_5 = arith.constant 512 : i32
    %32 = arith.cmpi sge, %31, %c512_i32_5 : i32
    %33 = arith.select %32, %24, %23 : i32
    %c268435456_i32 = arith.constant 268435456 : i32
    %34 = arith.ori %33, %c268435456_i32 : i32
    %35 = vector.broadcast %34 : i32 to vector<16x128xi32>
    %36 = arith.cmpi sge, %13, %35 : vector<16x128xi32>
    %37 = arith.extui %36 : vector<16x128xi1> to vector<16x128xi32>
    %38 = vector.shape_cast %37 : vector<16x128xi32> to vector<1x16x128xi32>
    %cst_6 = arith.constant dense<0> : vector<1xi32>
    %39 = vector.multi_reduction <add>, %38, %cst_6 [1, 2] : vector<1x16x128xi32> to vector<1xi32>
    %40 = vector.shape_cast %39 : vector<1xi32> to vector<1x1x1xi32>
    %41 = vector.extract %40[0, 0, 0] : i32 from vector<1x1x1xi32>
    %c512_i32_7 = arith.constant 512 : i32
    %42 = arith.cmpi sge, %41, %c512_i32_7 : i32
    %43 = arith.select %42, %34, %33 : i32
    %c134217728_i32 = arith.constant 134217728 : i32
    %44 = arith.ori %43, %c134217728_i32 : i32
    %45 = vector.broadcast %44 : i32 to vector<16x128xi32>
    %46 = arith.cmpi sge, %13, %45 : vector<16x128xi32>
    %47 = arith.extui %46 : vector<16x128xi1> to vector<16x128xi32>
    %48 = vector.shape_cast %47 : vector<16x128xi32> to vector<1x16x128xi32>
    %cst_8 = arith.constant dense<0> : vector<1xi32>
    %49 = vector.multi_reduction <add>, %48, %cst_8 [1, 2] : vector<1x16x128xi32> to vector<1xi32>
    %50 = vector.shape_cast %49 : vector<1xi32> to vector<1x1x1xi32>
    %51 = vector.extract %50[0, 0, 0] : i32 from vector<1x1x1xi32>
    %c512_i32_9 = arith.constant 512 : i32
    %52 = arith.cmpi sge, %51, %c512_i32_9 : i32
    %53 = arith.select %52, %44, %43 : i32
    %c67108864_i32 = arith.constant 67108864 : i32
    %54 = arith.ori %53, %c67108864_i32 : i32
    %55 = vector.broadcast %54 : i32 to vector<16x128xi32>
    %56 = arith.cmpi sge, %13, %55 : vector<16x128xi32>
    %57 = arith.extui %56 : vector<16x128xi1> to vector<16x128xi32>
    %58 = vector.shape_cast %57 : vector<16x128xi32> to vector<1x16x128xi32>
    %cst_10 = arith.constant dense<0> : vector<1xi32>
    %59 = vector.multi_reduction <add>, %58, %cst_10 [1, 2] : vector<1x16x128xi32> to vector<1xi32>
    %60 = vector.shape_cast %59 : vector<1xi32> to vector<1x1x1xi32>
    %61 = vector.extract %60[0, 0, 0] : i32 from vector<1x1x1xi32>
    %c512_i32_11 = arith.constant 512 : i32
    %62 = arith.cmpi sge, %61, %c512_i32_11 : i32
    %63 = arith.select %62, %54, %53 : i32
    %c33554432_i32 = arith.constant 33554432 : i32
    %64 = arith.ori %63, %c33554432_i32 : i32
    %65 = vector.broadcast %64 : i32 to vector<16x128xi32>
    %66 = arith.cmpi sge, %13, %65 : vector<16x128xi32>
    %67 = arith.extui %66 : vector<16x128xi1> to vector<16x128xi32>
    %68 = vector.shape_cast %67 : vector<16x128xi32> to vector<1x16x128xi32>
    %cst_12 = arith.constant dense<0> : vector<1xi32>
    %69 = vector.multi_reduction <add>, %68, %cst_12 [1, 2] : vector<1x16x128xi32> to vector<1xi32>
    %70 = vector.shape_cast %69 : vector<1xi32> to vector<1x1x1xi32>
    %71 = vector.extract %70[0, 0, 0] : i32 from vector<1x1x1xi32>
    %c512_i32_13 = arith.constant 512 : i32
    %72 = arith.cmpi sge, %71, %c512_i32_13 : i32
    %73 = arith.select %72, %64, %63 : i32
    %c16777216_i32 = arith.constant 16777216 : i32
    %74 = arith.ori %73, %c16777216_i32 : i32
    %75 = vector.broadcast %74 : i32 to vector<16x128xi32>
    %76 = arith.cmpi sge, %13, %75 : vector<16x128xi32>
    %77 = arith.extui %76 : vector<16x128xi1> to vector<16x128xi32>
    %78 = vector.shape_cast %77 : vector<16x128xi32> to vector<1x16x128xi32>
    %cst_14 = arith.constant dense<0> : vector<1xi32>
    %79 = vector.multi_reduction <add>, %78, %cst_14 [1, 2] : vector<1x16x128xi32> to vector<1xi32>
    %80 = vector.shape_cast %79 : vector<1xi32> to vector<1x1x1xi32>
    %81 = vector.extract %80[0, 0, 0] : i32 from vector<1x1x1xi32>
    %c512_i32_15 = arith.constant 512 : i32
    %82 = arith.cmpi sge, %81, %c512_i32_15 : i32
    %83 = arith.select %82, %74, %73 : i32
    %c8388608_i32 = arith.constant 8388608 : i32
    %84 = arith.ori %83, %c8388608_i32 : i32
    %85 = vector.broadcast %84 : i32 to vector<16x128xi32>
    %86 = arith.cmpi sge, %13, %85 : vector<16x128xi32>
    %87 = arith.extui %86 : vector<16x128xi1> to vector<16x128xi32>
    %88 = vector.shape_cast %87 : vector<16x128xi32> to vector<1x16x128xi32>
    %cst_16 = arith.constant dense<0> : vector<1xi32>
    %89 = vector.multi_reduction <add>, %88, %cst_16 [1, 2] : vector<1x16x128xi32> to vector<1xi32>
    %90 = vector.shape_cast %89 : vector<1xi32> to vector<1x1x1xi32>
    %91 = vector.extract %90[0, 0, 0] : i32 from vector<1x1x1xi32>
    %c512_i32_17 = arith.constant 512 : i32
    %92 = arith.cmpi sge, %91, %c512_i32_17 : i32
    %93 = arith.select %92, %84, %83 : i32
    %c4194304_i32 = arith.constant 4194304 : i32
    %94 = arith.ori %93, %c4194304_i32 : i32
    %95 = vector.broadcast %94 : i32 to vector<16x128xi32>
    %96 = arith.cmpi sge, %13, %95 : vector<16x128xi32>
    %97 = arith.extui %96 : vector<16x128xi1> to vector<16x128xi32>
    %98 = vector.shape_cast %97 : vector<16x128xi32> to vector<1x16x128xi32>
    %cst_18 = arith.constant dense<0> : vector<1xi32>
    %99 = vector.multi_reduction <add>, %98, %cst_18 [1, 2] : vector<1x16x128xi32> to vector<1xi32>
    %100 = vector.shape_cast %99 : vector<1xi32> to vector<1x1x1xi32>
    %101 = vector.extract %100[0, 0, 0] : i32 from vector<1x1x1xi32>
    %c512_i32_19 = arith.constant 512 : i32
    %102 = arith.cmpi sge, %101, %c512_i32_19 : i32
    %103 = arith.select %102, %94, %93 : i32
    %c2097152_i32 = arith.constant 2097152 : i32
    %104 = arith.ori %103, %c2097152_i32 : i32
    %105 = vector.broadcast %104 : i32 to vector<16x128xi32>
    %106 = arith.cmpi sge, %13, %105 : vector<16x128xi32>
    %107 = arith.extui %106 : vector<16x128xi1> to vector<16x128xi32>
    %108 = vector.shape_cast %107 : vector<16x128xi32> to vector<1x16x128xi32>
    %cst_20 = arith.constant dense<0> : vector<1xi32>
    %109 = vector.multi_reduction <add>, %108, %cst_20 [1, 2] : vector<1x16x128xi32> to vector<1xi32>
    %110 = vector.shape_cast %109 : vector<1xi32> to vector<1x1x1xi32>
    %111 = vector.extract %110[0, 0, 0] : i32 from vector<1x1x1xi32>
    %c512_i32_21 = arith.constant 512 : i32
    %112 = arith.cmpi sge, %111, %c512_i32_21 : i32
    %113 = arith.select %112, %104, %103 : i32
    %c1048576_i32 = arith.constant 1048576 : i32
    %114 = arith.ori %113, %c1048576_i32 : i32
    %115 = vector.broadcast %114 : i32 to vector<16x128xi32>
    %116 = arith.cmpi sge, %13, %115 : vector<16x128xi32>
    %117 = arith.extui %116 : vector<16x128xi1> to vector<16x128xi32>
    %118 = vector.shape_cast %117 : vector<16x128xi32> to vector<1x16x128xi32>
    %cst_22 = arith.constant dense<0> : vector<1xi32>
    %119 = vector.multi_reduction <add>, %118, %cst_22 [1, 2] : vector<1x16x128xi32> to vector<1xi32>
    %120 = vector.shape_cast %119 : vector<1xi32> to vector<1x1x1xi32>
    %121 = vector.extract %120[0, 0, 0] : i32 from vector<1x1x1xi32>
    %c512_i32_23 = arith.constant 512 : i32
    %122 = arith.cmpi sge, %121, %c512_i32_23 : i32
    %123 = arith.select %122, %114, %113 : i32
    %c524288_i32 = arith.constant 524288 : i32
    %124 = arith.ori %123, %c524288_i32 : i32
    %125 = vector.broadcast %124 : i32 to vector<16x128xi32>
    %126 = arith.cmpi sge, %13, %125 : vector<16x128xi32>
    %127 = arith.extui %126 : vector<16x128xi1> to vector<16x128xi32>
    %128 = vector.shape_cast %127 : vector<16x128xi32> to vector<1x16x128xi32>
    %cst_24 = arith.constant dense<0> : vector<1xi32>
    %129 = vector.multi_reduction <add>, %128, %cst_24 [1, 2] : vector<1x16x128xi32> to vector<1xi32>
    %130 = vector.shape_cast %129 : vector<1xi32> to vector<1x1x1xi32>
    %131 = vector.extract %130[0, 0, 0] : i32 from vector<1x1x1xi32>
    %c512_i32_25 = arith.constant 512 : i32
    %132 = arith.cmpi sge, %131, %c512_i32_25 : i32
    %133 = arith.select %132, %124, %123 : i32
    %c262144_i32 = arith.constant 262144 : i32
    %134 = arith.ori %133, %c262144_i32 : i32
    %135 = vector.broadcast %134 : i32 to vector<16x128xi32>
    %136 = arith.cmpi sge, %13, %135 : vector<16x128xi32>
    %137 = arith.extui %136 : vector<16x128xi1> to vector<16x128xi32>
    %138 = vector.shape_cast %137 : vector<16x128xi32> to vector<1x16x128xi32>
    %cst_26 = arith.constant dense<0> : vector<1xi32>
    %139 = vector.multi_reduction <add>, %138, %cst_26 [1, 2] : vector<1x16x128xi32> to vector<1xi32>
    %140 = vector.shape_cast %139 : vector<1xi32> to vector<1x1x1xi32>
    %141 = vector.extract %140[0, 0, 0] : i32 from vector<1x1x1xi32>
    %c512_i32_27 = arith.constant 512 : i32
    %142 = arith.cmpi sge, %141, %c512_i32_27 : i32
    %143 = arith.select %142, %134, %133 : i32
    %c131072_i32 = arith.constant 131072 : i32
    %144 = arith.ori %143, %c131072_i32 : i32
    %145 = vector.broadcast %144 : i32 to vector<16x128xi32>
    %146 = arith.cmpi sge, %13, %145 : vector<16x128xi32>
    %147 = arith.extui %146 : vector<16x128xi1> to vector<16x128xi32>
    %148 = vector.shape_cast %147 : vector<16x128xi32> to vector<1x16x128xi32>
    %cst_28 = arith.constant dense<0> : vector<1xi32>
    %149 = vector.multi_reduction <add>, %148, %cst_28 [1, 2] : vector<1x16x128xi32> to vector<1xi32>
    %150 = vector.shape_cast %149 : vector<1xi32> to vector<1x1x1xi32>
    %151 = vector.extract %150[0, 0, 0] : i32 from vector<1x1x1xi32>
    %c512_i32_29 = arith.constant 512 : i32
    %152 = arith.cmpi sge, %151, %c512_i32_29 : i32
    %153 = arith.select %152, %144, %143 : i32
    %c65536_i32 = arith.constant 65536 : i32
    %154 = arith.ori %153, %c65536_i32 : i32
    %155 = vector.broadcast %154 : i32 to vector<16x128xi32>
    %156 = arith.cmpi sge, %13, %155 : vector<16x128xi32>
    %157 = arith.extui %156 : vector<16x128xi1> to vector<16x128xi32>
    %158 = vector.shape_cast %157 : vector<16x128xi32> to vector<1x16x128xi32>
    %cst_30 = arith.constant dense<0> : vector<1xi32>
    %159 = vector.multi_reduction <add>, %158, %cst_30 [1, 2] : vector<1x16x128xi32> to vector<1xi32>
    %160 = vector.shape_cast %159 : vector<1xi32> to vector<1x1x1xi32>
    %161 = vector.extract %160[0, 0, 0] : i32 from vector<1x1x1xi32>
    %c512_i32_31 = arith.constant 512 : i32
    %162 = arith.cmpi sge, %161, %c512_i32_31 : i32
    %163 = arith.select %162, %154, %153 : i32
    %c32768_i32 = arith.constant 32768 : i32
    %164 = arith.ori %163, %c32768_i32 : i32
    %165 = vector.broadcast %164 : i32 to vector<16x128xi32>
    %166 = arith.cmpi sge, %13, %165 : vector<16x128xi32>
    %167 = arith.extui %166 : vector<16x128xi1> to vector<16x128xi32>
    %168 = vector.shape_cast %167 : vector<16x128xi32> to vector<1x16x128xi32>
    %cst_32 = arith.constant dense<0> : vector<1xi32>
    %169 = vector.multi_reduction <add>, %168, %cst_32 [1, 2] : vector<1x16x128xi32> to vector<1xi32>
    %170 = vector.shape_cast %169 : vector<1xi32> to vector<1x1x1xi32>
    %171 = vector.extract %170[0, 0, 0] : i32 from vector<1x1x1xi32>
    %c512_i32_33 = arith.constant 512 : i32
    %172 = arith.cmpi sge, %171, %c512_i32_33 : i32
    %173 = arith.select %172, %164, %163 : i32
    %c16384_i32 = arith.constant 16384 : i32
    %174 = arith.ori %173, %c16384_i32 : i32
    %175 = vector.broadcast %174 : i32 to vector<16x128xi32>
    %176 = arith.cmpi sge, %13, %175 : vector<16x128xi32>
    %177 = arith.extui %176 : vector<16x128xi1> to vector<16x128xi32>
    %178 = vector.shape_cast %177 : vector<16x128xi32> to vector<1x16x128xi32>
    %cst_34 = arith.constant dense<0> : vector<1xi32>
    %179 = vector.multi_reduction <add>, %178, %cst_34 [1, 2] : vector<1x16x128xi32> to vector<1xi32>
    %180 = vector.shape_cast %179 : vector<1xi32> to vector<1x1x1xi32>
    %181 = vector.extract %180[0, 0, 0] : i32 from vector<1x1x1xi32>
    %c512_i32_35 = arith.constant 512 : i32
    %182 = arith.cmpi sge, %181, %c512_i32_35 : i32
    %183 = arith.select %182, %174, %173 : i32
    %c8192_i32 = arith.constant 8192 : i32
    %184 = arith.ori %183, %c8192_i32 : i32
    %185 = vector.broadcast %184 : i32 to vector<16x128xi32>
    %186 = arith.cmpi sge, %13, %185 : vector<16x128xi32>
    %187 = arith.extui %186 : vector<16x128xi1> to vector<16x128xi32>
    %188 = vector.shape_cast %187 : vector<16x128xi32> to vector<1x16x128xi32>
    %cst_36 = arith.constant dense<0> : vector<1xi32>
    %189 = vector.multi_reduction <add>, %188, %cst_36 [1, 2] : vector<1x16x128xi32> to vector<1xi32>
    %190 = vector.shape_cast %189 : vector<1xi32> to vector<1x1x1xi32>
    %191 = vector.extract %190[0, 0, 0] : i32 from vector<1x1x1xi32>
    %c512_i32_37 = arith.constant 512 : i32
    %192 = arith.cmpi sge, %191, %c512_i32_37 : i32
    %193 = arith.select %192, %184, %183 : i32
    %c4096_i32 = arith.constant 4096 : i32
    %194 = arith.ori %193, %c4096_i32 : i32
    %195 = vector.broadcast %194 : i32 to vector<16x128xi32>
    %196 = arith.cmpi sge, %13, %195 : vector<16x128xi32>
    %197 = arith.extui %196 : vector<16x128xi1> to vector<16x128xi32>
    %198 = vector.shape_cast %197 : vector<16x128xi32> to vector<1x16x128xi32>
    %cst_38 = arith.constant dense<0> : vector<1xi32>
    %199 = vector.multi_reduction <add>, %198, %cst_38 [1, 2] : vector<1x16x128xi32> to vector<1xi32>
    %200 = vector.shape_cast %199 : vector<1xi32> to vector<1x1x1xi32>
    %201 = vector.extract %200[0, 0, 0] : i32 from vector<1x1x1xi32>
    %c512_i32_39 = arith.constant 512 : i32
    %202 = arith.cmpi sge, %201, %c512_i32_39 : i32
    %203 = arith.select %202, %194, %193 : i32
    %c2048_i32_40 = arith.constant 2048 : i32
    %204 = arith.ori %203, %c2048_i32_40 : i32
    %205 = vector.broadcast %204 : i32 to vector<16x128xi32>
    %206 = arith.cmpi sge, %13, %205 : vector<16x128xi32>
    %207 = arith.extui %206 : vector<16x128xi1> to vector<16x128xi32>
    %208 = vector.shape_cast %207 : vector<16x128xi32> to vector<1x16x128xi32>
    %cst_41 = arith.constant dense<0> : vector<1xi32>
    %209 = vector.multi_reduction <add>, %208, %cst_41 [1, 2] : vector<1x16x128xi32> to vector<1xi32>
    %210 = vector.shape_cast %209 : vector<1xi32> to vector<1x1x1xi32>
    %211 = vector.extract %210[0, 0, 0] : i32 from vector<1x1x1xi32>
    %c512_i32_42 = arith.constant 512 : i32
    %212 = arith.cmpi sge, %211, %c512_i32_42 : i32
    %213 = arith.select %212, %204, %203 : i32
    %c1024_i32 = arith.constant 1024 : i32
    %214 = arith.ori %213, %c1024_i32 : i32
    %215 = vector.broadcast %214 : i32 to vector<16x128xi32>
    %216 = arith.cmpi sge, %13, %215 : vector<16x128xi32>
    %217 = arith.extui %216 : vector<16x128xi1> to vector<16x128xi32>
    %218 = vector.shape_cast %217 : vector<16x128xi32> to vector<1x16x128xi32>
    %cst_43 = arith.constant dense<0> : vector<1xi32>
    %219 = vector.multi_reduction <add>, %218, %cst_43 [1, 2] : vector<1x16x128xi32> to vector<1xi32>
    %220 = vector.shape_cast %219 : vector<1xi32> to vector<1x1x1xi32>
    %221 = vector.extract %220[0, 0, 0] : i32 from vector<1x1x1xi32>
    %c512_i32_44 = arith.constant 512 : i32
    %222 = arith.cmpi sge, %221, %c512_i32_44 : i32
    %223 = arith.select %222, %214, %213 : i32
    %c512_i32_45 = arith.constant 512 : i32
    %224 = arith.ori %223, %c512_i32_45 : i32
    %225 = vector.broadcast %224 : i32 to vector<16x128xi32>
    %226 = arith.cmpi sge, %13, %225 : vector<16x128xi32>
    %227 = arith.extui %226 : vector<16x128xi1> to vector<16x128xi32>
    %228 = vector.shape_cast %227 : vector<16x128xi32> to vector<1x16x128xi32>
    %cst_46 = arith.constant dense<0> : vector<1xi32>
    %229 = vector.multi_reduction <add>, %228, %cst_46 [1, 2] : vector<1x16x128xi32> to vector<1xi32>
    %230 = vector.shape_cast %229 : vector<1xi32> to vector<1x1x1xi32>
    %231 = vector.extract %230[0, 0, 0] : i32 from vector<1x1x1xi32>
    %c512_i32_47 = arith.constant 512 : i32
    %232 = arith.cmpi sge, %231, %c512_i32_47 : i32
    %233 = arith.select %232, %224, %223 : i32
    %c256_i32 = arith.constant 256 : i32
    %234 = arith.ori %233, %c256_i32 : i32
    %235 = vector.broadcast %234 : i32 to vector<16x128xi32>
    %236 = arith.cmpi sge, %13, %235 : vector<16x128xi32>
    %237 = arith.extui %236 : vector<16x128xi1> to vector<16x128xi32>
    %238 = vector.shape_cast %237 : vector<16x128xi32> to vector<1x16x128xi32>
    %cst_48 = arith.constant dense<0> : vector<1xi32>
    %239 = vector.multi_reduction <add>, %238, %cst_48 [1, 2] : vector<1x16x128xi32> to vector<1xi32>
    %240 = vector.shape_cast %239 : vector<1xi32> to vector<1x1x1xi32>
    %241 = vector.extract %240[0, 0, 0] : i32 from vector<1x1x1xi32>
    %c512_i32_49 = arith.constant 512 : i32
    %242 = arith.cmpi sge, %241, %c512_i32_49 : i32
    %243 = arith.select %242, %234, %233 : i32
    %c128_i32_50 = arith.constant 128 : i32
    %244 = arith.ori %243, %c128_i32_50 : i32
    %245 = vector.broadcast %244 : i32 to vector<16x128xi32>
    %246 = arith.cmpi sge, %13, %245 : vector<16x128xi32>
    %247 = arith.extui %246 : vector<16x128xi1> to vector<16x128xi32>
    %248 = vector.shape_cast %247 : vector<16x128xi32> to vector<1x16x128xi32>
    %cst_51 = arith.constant dense<0> : vector<1xi32>
    %249 = vector.multi_reduction <add>, %248, %cst_51 [1, 2] : vector<1x16x128xi32> to vector<1xi32>
    %250 = vector.shape_cast %249 : vector<1xi32> to vector<1x1x1xi32>
    %251 = vector.extract %250[0, 0, 0] : i32 from vector<1x1x1xi32>
    %c512_i32_52 = arith.constant 512 : i32
    %252 = arith.cmpi sge, %251, %c512_i32_52 : i32
    %253 = arith.select %252, %244, %243 : i32
    %c64_i32 = arith.constant 64 : i32
    %254 = arith.ori %253, %c64_i32 : i32
    %255 = vector.broadcast %254 : i32 to vector<16x128xi32>
    %256 = arith.cmpi sge, %13, %255 : vector<16x128xi32>
    %257 = arith.extui %256 : vector<16x128xi1> to vector<16x128xi32>
    %258 = vector.shape_cast %257 : vector<16x128xi32> to vector<1x16x128xi32>
    %cst_53 = arith.constant dense<0> : vector<1xi32>
    %259 = vector.multi_reduction <add>, %258, %cst_53 [1, 2] : vector<1x16x128xi32> to vector<1xi32>
    %260 = vector.shape_cast %259 : vector<1xi32> to vector<1x1x1xi32>
    %261 = vector.extract %260[0, 0, 0] : i32 from vector<1x1x1xi32>
    %c512_i32_54 = arith.constant 512 : i32
    %262 = arith.cmpi sge, %261, %c512_i32_54 : i32
    %263 = arith.select %262, %254, %253 : i32
    %c32_i32 = arith.constant 32 : i32
    %264 = arith.ori %263, %c32_i32 : i32
    %265 = vector.broadcast %264 : i32 to vector<16x128xi32>
    %266 = arith.cmpi sge, %13, %265 : vector<16x128xi32>
    %267 = arith.extui %266 : vector<16x128xi1> to vector<16x128xi32>
    %268 = vector.shape_cast %267 : vector<16x128xi32> to vector<1x16x128xi32>
    %cst_55 = arith.constant dense<0> : vector<1xi32>
    %269 = vector.multi_reduction <add>, %268, %cst_55 [1, 2] : vector<1x16x128xi32> to vector<1xi32>
    %270 = vector.shape_cast %269 : vector<1xi32> to vector<1x1x1xi32>
    %271 = vector.extract %270[0, 0, 0] : i32 from vector<1x1x1xi32>
    %c512_i32_56 = arith.constant 512 : i32
    %272 = arith.cmpi sge, %271, %c512_i32_56 : i32
    %273 = arith.select %272, %264, %263 : i32
    %c16_i32 = arith.constant 16 : i32
    %274 = arith.ori %273, %c16_i32 : i32
    %275 = vector.broadcast %274 : i32 to vector<16x128xi32>
    %276 = arith.cmpi sge, %13, %275 : vector<16x128xi32>
    %277 = arith.extui %276 : vector<16x128xi1> to vector<16x128xi32>
    %278 = vector.shape_cast %277 : vector<16x128xi32> to vector<1x16x128xi32>
    %cst_57 = arith.constant dense<0> : vector<1xi32>
    %279 = vector.multi_reduction <add>, %278, %cst_57 [1, 2] : vector<1x16x128xi32> to vector<1xi32>
    %280 = vector.shape_cast %279 : vector<1xi32> to vector<1x1x1xi32>
    %281 = vector.extract %280[0, 0, 0] : i32 from vector<1x1x1xi32>
    %c512_i32_58 = arith.constant 512 : i32
    %282 = arith.cmpi sge, %281, %c512_i32_58 : i32
    %283 = arith.select %282, %274, %273 : i32
    %c8_i32 = arith.constant 8 : i32
    %284 = arith.ori %283, %c8_i32 : i32
    %285 = vector.broadcast %284 : i32 to vector<16x128xi32>
    %286 = arith.cmpi sge, %13, %285 : vector<16x128xi32>
    %287 = arith.extui %286 : vector<16x128xi1> to vector<16x128xi32>
    %288 = vector.shape_cast %287 : vector<16x128xi32> to vector<1x16x128xi32>
    %cst_59 = arith.constant dense<0> : vector<1xi32>
    %289 = vector.multi_reduction <add>, %288, %cst_59 [1, 2] : vector<1x16x128xi32> to vector<1xi32>
    %290 = vector.shape_cast %289 : vector<1xi32> to vector<1x1x1xi32>
    %291 = vector.extract %290[0, 0, 0] : i32 from vector<1x1x1xi32>
    %c512_i32_60 = arith.constant 512 : i32
    %292 = arith.cmpi sge, %291, %c512_i32_60 : i32
    %293 = arith.select %292, %284, %283 : i32
    %c4_i32 = arith.constant 4 : i32
    %294 = arith.ori %293, %c4_i32 : i32
    %295 = vector.broadcast %294 : i32 to vector<16x128xi32>
    %296 = arith.cmpi sge, %13, %295 : vector<16x128xi32>
    %297 = arith.extui %296 : vector<16x128xi1> to vector<16x128xi32>
    %298 = vector.shape_cast %297 : vector<16x128xi32> to vector<1x16x128xi32>
    %cst_61 = arith.constant dense<0> : vector<1xi32>
    %299 = vector.multi_reduction <add>, %298, %cst_61 [1, 2] : vector<1x16x128xi32> to vector<1xi32>
    %300 = vector.shape_cast %299 : vector<1xi32> to vector<1x1x1xi32>
    %301 = vector.extract %300[0, 0, 0] : i32 from vector<1x1x1xi32>
    %c512_i32_62 = arith.constant 512 : i32
    %302 = arith.cmpi sge, %301, %c512_i32_62 : i32
    %303 = arith.select %302, %294, %293 : i32
    %c2_i32 = arith.constant 2 : i32
    %304 = arith.ori %303, %c2_i32 : i32
    %305 = vector.broadcast %304 : i32 to vector<16x128xi32>
    %306 = arith.cmpi sge, %13, %305 : vector<16x128xi32>
    %307 = arith.extui %306 : vector<16x128xi1> to vector<16x128xi32>
    %308 = vector.shape_cast %307 : vector<16x128xi32> to vector<1x16x128xi32>
    %cst_63 = arith.constant dense<0> : vector<1xi32>
    %309 = vector.multi_reduction <add>, %308, %cst_63 [1, 2] : vector<1x16x128xi32> to vector<1xi32>
    %310 = vector.shape_cast %309 : vector<1xi32> to vector<1x1x1xi32>
    %311 = vector.extract %310[0, 0, 0] : i32 from vector<1x1x1xi32>
    %c512_i32_64 = arith.constant 512 : i32
    %312 = arith.cmpi sge, %311, %c512_i32_64 : i32
    %313 = arith.select %312, %304, %303 : i32
    %c1_i32 = arith.constant 1 : i32
    %314 = arith.ori %313, %c1_i32 : i32
    %315 = vector.broadcast %314 : i32 to vector<16x128xi32>
    %316 = arith.cmpi sge, %13, %315 : vector<16x128xi32>
    %317 = arith.extui %316 : vector<16x128xi1> to vector<16x128xi32>
    %318 = vector.shape_cast %317 : vector<16x128xi32> to vector<1x16x128xi32>
    %cst_65 = arith.constant dense<0> : vector<1xi32>
    %319 = vector.multi_reduction <add>, %318, %cst_65 [1, 2] : vector<1x16x128xi32> to vector<1xi32>
    %320 = vector.shape_cast %319 : vector<1xi32> to vector<1x1x1xi32>
    %321 = vector.extract %320[0, 0, 0] : i32 from vector<1x1x1xi32>
    %c512_i32_66 = arith.constant 512 : i32
    %322 = arith.cmpi sge, %321, %c512_i32_66 : i32
    %323 = arith.select %322, %314, %313 : i32
    %324 = vector.broadcast %323 : i32 to vector<16x128xi32>
    %325 = arith.cmpi sgt, %13, %324 : vector<16x128xi32>
    %326 = arith.extui %325 : vector<16x128xi1> to vector<16x128xi32>
    %327 = vector.shape_cast %326 : vector<16x128xi32> to vector<1x16x128xi32>
    %cst_67 = arith.constant dense<0> : vector<1xi32>
    %328 = vector.multi_reduction <add>, %327, %cst_67 [1, 2] : vector<1x16x128xi32> to vector<1xi32>
    %329 = vector.shape_cast %328 : vector<1xi32> to vector<1x1x1xi32>
    %330 = vector.extract %329[0, 0, 0] : i32 from vector<1x1x1xi32>
    %cst_68 = arith.constant 0.000000e+00 : f32
    %331 = vector.broadcast %cst_68 : f32 to vector<16x128xf32>
    %332 = arith.select %325, %3, %331 : vector<16x128xi1>, vector<16x128xf32>
    %333 = vector.shape_cast %332 : vector<16x128xf32> to vector<1x16x128xf32>
    %cst_69 = arith.constant dense<0.000000e+00> : vector<1xf32>
    %334 = vector.multi_reduction <add>, %333, %cst_69 [1, 2] : vector<1x16x128xf32> to vector<1xf32>
    %335 = vector.shape_cast %334 : vector<1xf32> to vector<1x1x1xf32>
    %336 = vector.extract %335[0, 0, 0] : f32 from vector<1x1x1xf32>
    %337 = vector.broadcast %323 : i32 to vector<16x128xi32>
    %338 = arith.cmpi eq, %13, %337 : vector<16x128xi32>
    %cst_70 = arith.constant 0.000000e+00 : f32
    %339 = vector.broadcast %cst_70 : f32 to vector<16x128xf32>
    %340 = arith.select %338, %3, %339 : vector<16x128xi1>, vector<16x128xf32>
    %341 = vector.shape_cast %340 : vector<16x128xf32> to vector<1x16x128xf32>
    %cst_71 = arith.constant dense<0xFF800000> : vector<1xf32>
    %342 = vector.multi_reduction <maximumf>, %341, %cst_71 [1, 2] : vector<1x16x128xf32> to vector<1xf32>
    %343 = vector.shape_cast %342 : vector<1xf32> to vector<1x1x1xf32>
    %344 = vector.extract %343[0, 0, 0] : f32 from vector<1x1x1xf32>
    %c512_i32_72 = arith.constant 512 : i32
    %345 = arith.subi %c512_i32_72, %330 : i32
    %346 = arith.sitofp %345 : i32 to f32
    %347 = arith.mulf %346, %344 : f32
    %348 = arith.addf %336, %347 : f32
    %cst_73 = arith.constant 0.001953125 : f32
    %349 = arith.mulf %348, %cst_73 : f32
    %cst_74 = arith.constant 0.000000e+00 : f32
    %350 = vector.broadcast %cst_74 : f32 to vector<1x128xf32>
    %351 = vector.broadcast %349 : f32 to vector<1x128xf32>
    %352 = arith.addf %350, %351 : vector<1x128xf32>
    %c0_75 = arith.constant 0 : index
    %c0_76 = arith.constant 0 : index
    %353 = vector.load %arg3[%c0_75, %c0_76] : memref<1x128xf32, #tpu.memory_space<vmem>>, vector<1x128xf32>
    tpu.vector_store %arg3[%c0_75, %c0_76], %352 {strides = array<i32>} : memref<1x128xf32, #tpu.memory_space<vmem>>, vector<1x128xf32>,
    return
  }
  func.func @transform_0(%arg0: i32) -> (i32, i32) {
    %c0_i32 = arith.constant 0 : i32
    %c0_i32_0 = arith.constant 0 : i32
    %c0_i32_1 = arith.constant 0 : i32
    return %c0_i32, %c0_i32_0 : i32, i32
  }
  func.func @transform_1(%arg0: i32) -> (i32, i32) {
    %c0_i32 = arith.constant 0 : i32
    %c0_i32_0 = arith.constant 0 : i32
    %c0_i32_1 = arith.constant 0 : i32
    return %c0_i32, %c0_i32_0 : i32, i32
  }
  func.func @transform_2(%arg0: i32) -> (i32, i32) {
    %c0_i32 = arith.constant 0 : i32
    %c0_i32_0 = arith.constant 0 : i32
    %c0_i32_1 = arith.constant 0 : i32
    return %c0_i32, %c0_i32_0 : i32, i32
  }
}

</mosaic_0001>

<bundles_post_ra>
// kernel: _lambda_.1
= control target key start
LH: loop header
LB: loop body
LE: loop exit
PB: predicated region body
PF: predicated region fallthrough
CT: control target
= control target key end

     0   :  { %v20_v3 = vlaneseq  ;;  %s1373_s0 = inlined_call_operand.vmem [shape: f32[16,128], index: 0, kind: input, shape index: {}]   ;;  %s1374_s1 = inlined_call_operand.vmem [shape: f32[16,128], index: 1, kind: input, shape index: {}]   ;;  %s1375_s2 = inlined_call_operand.hbm [shape: f32[1,128], index: 2, kind: output, shape index: {}]  }
   0x1   :  { %v12_v0 = vld [vmem:[%s1373_s0] sm:$0xff]  ;;  %v13_v1 = vld [vmem:[%s1373_s0 + $0x8] sm:$0xff] }
   0x2   :  { %v14_v2 = vld [vmem:[%s1374_s1] sm:$0xff]  ;;  %v15_v4 = vld [vmem:[%s1374_s1 + $0x8] sm:$0xff] }
   0x3   :  { %v16_v5 = vsub.f32 %v12_v0, %v14_v2 }
   0x4   :  { %7 = vsyncpa [#allocation3], 0  ;;  %v21_v6 = vshrl.u32 %v20_v3, 7  ;;  %v24_v7 = vand.u32 127, %v20_v3  ;;  %v17_v8 = vsub.f32 %v13_v1, %v15_v4  ;;  %v1068_v18 = vmov 0  }
   0x5   :  { %v1097_v11 = vand.u32 2147483647, %v16_v5 }
   0x6   :  { %v22_v9 = vadd.s32 8, %v21_v6  ;;  %v25_v10 = vmul.u32 128, %v21_v6  ;;  %v1099_v14 = vand.u32 2147483647, %v17_v8 }
   0x8   :  { %v26_v12 = vmul.u32 128, %v22_v9  ;;  %v27_v13 = vadd.s32 %v25_v10, %v24_v7 }
   0xa   :  { %v28_v15 = vadd.s32 %v26_v12, %v24_v7  ;;  %vm29_vm0 = vcmp.lt.s32.totalorder %v27_v13, 2048 }
   0xb   :  { %v1102_v16 = vsel %vm29_vm0, %v1097_v11, 4294967295 }
   0xc   :  { %vm30_vm1 = vcmp.lt.s32.totalorder %v28_v15, 2048  ;;  %vm35_vm2 = vcmp.ge.s32.totalorder %v1102_v16, 1073741824 }
   0xd   :  { %v1106_v17 = vsel %vm30_vm1, %v1099_v14, 4294967295  ;;  %v37_v19 = vsel %vm35_vm2, 1, %v1068_v18 }
   0xe   :  { %vm36_vm3 = vcmp.ge.s32.totalorder %v1106_v17, 1073741824 }
   0xf   :  { %v38_v20 = vsel %vm36_vm3, 1, %v1068_v18 }
  0x10   :  { %v39_v21 = vadd.s32 %v38_v20, %v37_v19 }
  0x12   :  { %v41_v22 = vshrl.u32 %v39_v21, 16  ;;  %v40_v23 = vand.u32 65535, %v39_v21 }
  0x14   :  { %v43_v24 = vcvt.s32.f32 %v41_v22  ;;  %v42_v25 = vcvt.s32.f32 %v40_v23 }
  0x16   :  { %46 = vadd.xlane.f32.xlu0 %v43_v24 }
  0x1a   :  { %44 = vadd.xlane.f32.xlu0 %v42_v25 }
  0xa3   :  { %v47_v26 = vpop.xlane.xlu0 %46 }
  0xa4   :  { %v49_v27 = vcvt.f32.s32 %v47_v26 }
  0xa6   :  { %v50_v29 = vshll.u32 %v49_v27, 16 }
  0xa7   :  { %v45_v28 = vpop.xlane.xlu0 %44 }
  0xa8   :  { %v48_v30 = vcvt.f32.s32 %v45_v28 }
  0xaa   :  { %v51_v31 = vadd.s32 %v50_v29, %v48_v30 }
  0xac   :  { %v52_v32 = vrot.slane %v51_v31, 4 }
  0xae   :  { %v53_v33 = vadd.s32 %v52_v32, %v51_v31 }
  0xb0   :  { %v54_v34 = vrot.slane %v53_v33, 2 }
  0xb2   :  { %v55_v35 = vadd.s32 %v54_v34, %v53_v33 }
  0xb4   :  { %v56_v36 = vrot.slane %v55_v35, 1 }
  0xb6   :  { %v57_v37 = vadd.s32 %v56_v36, %v55_v35 }
  0xb8   :  { %974 = vpush %v57_v37 }
  0xe9   :  { %s975_s0 = spop %974 }
  0xea   :  { %p59_p0 = scmp.ge.s32.totalorder %s975_s0, 512 }
  0xec   :  { %s1111_s1 = scalar_select %p59_p0, 1073741824, 0 }
  0xee   :  { %s61_s17 = sor.u32 536870912, %s1111_s1 }
  0xef   :  { %v62_v38 = vstv %s61_s17 }
  0xf0   :  { %vm63_vm4 = vcmp.ge.s32.totalorder %v1102_v16, %v62_v38  ;;  %vm64_vm5 = vcmp.ge.s32.totalorder %v1106_v17, %v62_v38 }
  0xf1   :  { %v65_v39 = vsel %vm63_vm4, 1, %v1068_v18  ;;  %v66_v40 = vsel %vm64_vm5, 1, %v1068_v18 }
  0xf2   :  { %v67_v41 = vadd.s32 %v66_v40, %v65_v39 }
  0xf4   :  { %v69_v42 = vshrl.u32 %v67_v41, 16  ;;  %v68_v44 = vand.u32 65535, %v67_v41 }
  0xf6   :  { %v71_v43 = vcvt.s32.f32 %v69_v42  ;;  %v70_v45 = vcvt.s32.f32 %v68_v44 }
  0xf8   :  { %74 = vadd.xlane.f32.xlu1 %v71_v43 }
  0xfc   :  { %72 = vadd.xlane.f32.xlu1 %v70_v45 }
 0x185   :  { %v75_v46 = vpop.xlane.xlu1 %74 }
 0x186   :  { %v77_v47 = vcvt.f32.s32 %v75_v46 }
 0x188   :  { %v78_v49 = vshll.u32 %v77_v47, 16 }
 0x189   :  { %v73_v48 = vpop.xlane.xlu1 %72 }
 0x18a   :  { %v76_v50 = vcvt.f32.s32 %v73_v48 }
 0x18c   :  { %v79_v51 = vadd.s32 %v78_v49, %v76_v50 }
 0x18e   :  { %v80_v52 = vrot.slane %v79_v51, 4 }
 0x190   :  { %v81_v53 = vadd.s32 %v80_v52, %v79_v51 }
 0x192   :  { %v82_v54 = vrot.slane %v81_v53, 2 }
 0x194   :  { %v83_v55 = vadd.s32 %v82_v54, %v81_v53 }
 0x196   :  { %v84_v56 = vrot.slane %v83_v55, 1 }
 0x198   :  { %v85_v57 = vadd.s32 %v84_v56, %v83_v55 }
 0x19a   :  { %976 = vpush %v85_v57 }
 0x1cb   :  { %s977_s18 = spop %976 }
 0x1cc   :  { %p87_p1 = scmp.ge.s32.totalorder %s977_s18, 512 }
 0x1ce   :  { %s1377_s17 = smov (!%p87_p1, %s61_s17), %s1111_s1 }
 0x1cf   :  { %s89_s19 = sor.u32 268435456, %s1377_s17 }
 0x1d0   :  { %v90_v58 = vstv %s89_s19 }
 0x1d1   :  { %vm91_vm6 = vcmp.ge.s32.totalorder %v1102_v16, %v90_v58  ;;  %vm92_vm7 = vcmp.ge.s32.totalorder %v1106_v17, %v90_v58 }
 0x1d2   :  { %v93_v59 = vsel %vm91_vm6, 1, %v1068_v18  ;;  %v94_v60 = vsel %vm92_vm7, 1, %v1068_v18 }
 0x1d3   :  { %v95_v61 = vadd.s32 %v94_v60, %v93_v59 }
 0x1d5   :  { %v97_v62 = vshrl.u32 %v95_v61, 16  ;;  %v96_v63 = vand.u32 65535, %v95_v61 }
 0x1d7   :  { %v99_v0 = vcvt.s32.f32 %v97_v62  ;;  %v98_v1 = vcvt.s32.f32 %v96_v63 }
 0x1d9   :  { %102 = vadd.xlane.f32.xlu0 %v99_v0  ;;  %100 = vadd.xlane.f32.xlu1 %v98_v1 }
 0x266   :  { %v103_v2 = vpop.xlane.xlu0 %102  ;;  %v101_v3 = vpop.xlane.xlu1 %100 }
 0x267   :  { %v105_v4 = vcvt.f32.s32 %v103_v2  ;;  %v104_v6 = vcvt.f32.s32 %v101_v3 }
 0x269   :  { %v106_v5 = vshll.u32 %v105_v4, 16 }
 0x26b   :  { %v107_v7 = vadd.s32 %v106_v5, %v104_v6 }
 0x26d   :  { %v108_v8 = vrot.slane %v107_v7, 4 }
 0x26f   :  { %v109_v9 = vadd.s32 %v108_v8, %v107_v7 }
 0x271   :  { %v110_v10 = vrot.slane %v109_v9, 2 }
 0x273   :  { %v111_v12 = vadd.s32 %v110_v10, %v109_v9 }
 0x275   :  { %v112_v13 = vrot.slane %v111_v12, 1 }
 0x277   :  { %v113_v15 = vadd.s32 %v112_v13, %v111_v12 }
 0x279   :  { %978 = vpush %v113_v15 }
 0x2aa   :  { %s979_s20 = spop %978 }
 0x2ab   :  { %p115_p2 = scmp.ge.s32.totalorder %s979_s20, 512 }
 0x2ad   :  { %s1379_s19 = smov (!%p115_p2, %s89_s19), %s1377_s17 }
 0x2ae   :  { %s117_s21 = sor.u32 134217728, %s1379_s19 }
 0x2af   :  { %v118_v19 = vstv %s117_s21 }
 0x2b0   :  { %vm119_vm8 = vcmp.ge.s32.totalorder %v1102_v16, %v118_v19  ;;  %vm120_vm9 = vcmp.ge.s32.totalorder %v1106_v17, %v118_v19 }
 0x2b1   :  { %v121_v20 = vsel %vm119_vm8, 1, %v1068_v18  ;;  %v122_v21 = vsel %vm120_vm9, 1, %v1068_v18 }
 0x2b2   :  { %v123_v22 = vadd.s32 %v122_v21, %v121_v20 }
 0x2b4   :  { %v125_v23 = vshrl.u32 %v123_v22, 16  ;;  %v124_v24 = vand.u32 65535, %v123_v22 }
 0x2b6   :  { %v127_v25 = vcvt.s32.f32 %v125_v23  ;;  %v126_v26 = vcvt.s32.f32 %v124_v24 }
 0x2b8   :  { %130 = vadd.xlane.f32.xlu0 %v127_v25  ;;  %128 = vadd.xlane.f32.xlu1 %v126_v26 }
 0x345   :  { %v131_v27 = vpop.xlane.xlu0 %130  ;;  %v129_v28 = vpop.xlane.xlu1 %128 }
 0x346   :  { %v133_v29 = vcvt.f32.s32 %v131_v27  ;;  %v132_v31 = vcvt.f32.s32 %v129_v28 }
 0x348   :  { %v134_v30 = vshll.u32 %v133_v29, 16 }
 0x34a   :  { %v135_v32 = vadd.s32 %v134_v30, %v132_v31 }
 0x34c   :  { %v136_v33 = vrot.slane %v135_v32, 4 }
 0x34e   :  { %v137_v34 = vadd.s32 %v136_v33, %v135_v32 }
 0x350   :  { %v138_v35 = vrot.slane %v137_v34, 2 }
 0x352   :  { %v139_v36 = vadd.s32 %v138_v35, %v137_v34 }
 0x354   :  { %v140_v37 = vrot.slane %v139_v36, 1 }
 0x356   :  { %v141_v38 = vadd.s32 %v140_v37, %v139_v36 }
 0x358   :  { %980 = vpush %v141_v38 }
 0x389   :  { %s981_s22 = spop %980 }
 0x38a   :  { %p143_p3 = scmp.ge.s32.totalorder %s981_s22, 512 }
 0x38c   :  { %s1381_s21 = smov (!%p143_p3, %s117_s21), %s1379_s19 }
 0x38d   :  { %s145_s23 = sor.u32 67108864, %s1381_s21 }
 0x38e   :  { %v146_v39 = vstv %s145_s23 }
 0x38f   :  { %vm147_vm10 = vcmp.ge.s32.totalorder %v1102_v16, %v146_v39  ;;  %vm148_vm11 = vcmp.ge.s32.totalorder %v1106_v17, %v146_v39 }
 0x390   :  { %v149_v40 = vsel %vm147_vm10, 1, %v1068_v18  ;;  %v150_v41 = vsel %vm148_vm11, 1, %v1068_v18 }
 0x391   :  { %v151_v42 = vadd.s32 %v150_v41, %v149_v40 }
 0x393   :  { %v153_v43 = vshrl.u32 %v151_v42, 16  ;;  %v152_v44 = vand.u32 65535, %v151_v42 }
 0x395   :  { %v155_v45 = vcvt.s32.f32 %v153_v43  ;;  %v154_v46 = vcvt.s32.f32 %v152_v44 }
 0x397   :  { %158 = vadd.xlane.f32.xlu0 %v155_v45  ;;  %156 = vadd.xlane.f32.xlu1 %v154_v46 }
 0x424   :  { %v159_v47 = vpop.xlane.xlu0 %158  ;;  %v157_v48 = vpop.xlane.xlu1 %156 }
 0x425   :  { %v161_v49 = vcvt.f32.s32 %v159_v47  ;;  %v160_v51 = vcvt.f32.s32 %v157_v48 }
 0x427   :  { %v162_v50 = vshll.u32 %v161_v49, 16 }
 0x429   :  { %v163_v52 = vadd.s32 %v162_v50, %v160_v51 }
 0x42b   :  { %v164_v53 = vrot.slane %v163_v52, 4 }
 0x42d   :  { %v165_v54 = vadd.s32 %v164_v53, %v163_v52 }
 0x42f   :  { %v166_v55 = vrot.slane %v165_v54, 2 }
 0x431   :  { %v167_v56 = vadd.s32 %v166_v55, %v165_v54 }
 0x433   :  { %v168_v57 = vrot.slane %v167_v56, 1 }
 0x435   :  { %v169_v58 = vadd.s32 %v168_v57, %v167_v56 }
 0x437   :  { %982 = vpush %v169_v58 }
 0x468   :  { %s983_s24 = spop %982 }
 0x469   :  { %p171_p4 = scmp.ge.s32.totalorder %s983_s24, 512 }
 0x46b   :  { %s1383_s23 = smov (!%p171_p4, %s145_s23), %s1381_s21 }
 0x46c   :  { %s173_s25 = sor.u32 33554432, %s1383_s23 }
 0x46d   :  { %v174_v59 = vstv %s173_s25 }
 0x46e   :  { %vm175_vm12 = vcmp.ge.s32.totalorder %v1102_v16, %v174_v59  ;;  %vm176_vm13 = vcmp.ge.s32.totalorder %v1106_v17, %v174_v59 }
 0x46f   :  { %v177_v60 = vsel %vm175_vm12, 1, %v1068_v18  ;;  %v178_v61 = vsel %vm176_vm13, 1, %v1068_v18 }
 0x470   :  { %v179_v62 = vadd.s32 %v178_v61, %v177_v60 }
 0x472   :  { %v181_v63 = vshrl.u32 %v179_v62, 16  ;;  %v180_v0 = vand.u32 65535, %v179_v62 }
 0x474   :  { %v183_v1 = vcvt.s32.f32 %v181_v63  ;;  %v182_v2 = vcvt.s32.f32 %v180_v0 }
 0x476   :  { %186 = vadd.xlane.f32.xlu0 %v183_v1  ;;  %184 = vadd.xlane.f32.xlu1 %v182_v2 }
 0x503   :  { %v187_v3 = vpop.xlane.xlu0 %186  ;;  %v185_v4 = vpop.xlane.xlu1 %184 }
 0x504   :  { %v189_v5 = vcvt.f32.s32 %v187_v3  ;;  %v188_v7 = vcvt.f32.s32 %v185_v4 }
 0x506   :  { %v190_v6 = vshll.u32 %v189_v5, 16 }
 0x508   :  { %v191_v8 = vadd.s32 %v190_v6, %v188_v7 }
 0x50a   :  { %v192_v9 = vrot.slane %v191_v8, 4 }
 0x50c   :  { %v193_v10 = vadd.s32 %v192_v9, %v191_v8 }
 0x50e   :  { %v194_v12 = vrot.slane %v193_v10, 2 }
 0x510   :  { %v195_v13 = vadd.s32 %v194_v12, %v193_v10 }
 0x512   :  { %v196_v15 = vrot.slane %v195_v13, 1 }
 0x514   :  { %v197_v19 = vadd.s32 %v196_v15, %v195_v13 }
 0x516   :  { %984 = vpush %v197_v19 }
 0x547   :  { %s985_s26 = spop %984 }
 0x548   :  { %p199_p5 = scmp.ge.s32.totalorder %s985_s26, 512 }
 0x54a   :  { %s1385_s25 = smov (!%p199_p5, %s173_s25), %s1383_s23 }
 0x54b   :  { %s201_s27 = sor.u32 16777216, %s1385_s25 }
 0x54c   :  { %v202_v20 = vstv %s201_s27 }
 0x54d   :  { %vm203_vm14 = vcmp.ge.s32.totalorder %v1102_v16, %v202_v20  ;;  %vm204_vm15 = vcmp.ge.s32.totalorder %v1106_v17, %v202_v20 }
 0x54e   :  { %v205_v21 = vsel %vm203_vm14, 1, %v1068_v18  ;;  %v206_v22 = vsel %vm204_vm15, 1, %v1068_v18 }
 0x54f   :  { %v207_v23 = vadd.s32 %v206_v22, %v205_v21 }
 0x551   :  { %v209_v24 = vshrl.u32 %v207_v23, 16  ;;  %v208_v25 = vand.u32 65535, %v207_v23 }
 0x553   :  { %v211_v26 = vcvt.s32.f32 %v209_v24  ;;  %v210_v27 = vcvt.s32.f32 %v208_v25 }
 0x555   :  { %214 = vadd.xlane.f32.xlu0 %v211_v26  ;;  %212 = vadd.xlane.f32.xlu1 %v210_v27 }
 0x5e2   :  { %v215_v28 = vpop.xlane.xlu0 %214  ;;  %v213_v29 = vpop.xlane.xlu1 %212 }
 0x5e3   :  { %v217_v30 = vcvt.f32.s32 %v215_v28  ;;  %v216_v32 = vcvt.f32.s32 %v213_v29 }
 0x5e5   :  { %v218_v31 = vshll.u32 %v217_v30, 16 }
 0x5e7   :  { %v219_v33 = vadd.s32 %v218_v31, %v216_v32 }
 0x5e9   :  { %v220_v34 = vrot.slane %v219_v33, 4 }
 0x5eb   :  { %v221_v35 = vadd.s32 %v220_v34, %v219_v33 }
 0x5ed   :  { %v222_v36 = vrot.slane %v221_v35, 2 }
 0x5ef   :  { %v223_v37 = vadd.s32 %v222_v36, %v221_v35 }
 0x5f1   :  { %v224_v38 = vrot.slane %v223_v37, 1 }
 0x5f3   :  { %v225_v39 = vadd.s32 %v224_v38, %v223_v37 }
 0x5f5   :  { %986 = vpush %v225_v39 }
 0x626   :  { %s987_s28 = spop %986 }
 0x627   :  { %p227_p6 = scmp.ge.s32.totalorder %s987_s28, 512 }
 0x629   :  { %s1387_s27 = smov (!%p227_p6, %s201_s27), %s1385_s25 }
 0x62a   :  { %s229_s29 = sor.u32 8388608, %s1387_s27 }
 0x62b   :  { %v230_v40 = vstv %s229_s29 }
 0x62c   :  { %vm231_vm0 = vcmp.ge.s32.totalorder %v1102_v16, %v230_v40  ;;  %vm232_vm1 = vcmp.ge.s32.totalorder %v1106_v17, %v230_v40 }
 0x62d   :  { %v233_v41 = vsel %vm231_vm0, 1, %v1068_v18  ;;  %v234_v42 = vsel %vm232_vm1, 1, %v1068_v18 }
 0x62e   :  { %v235_v43 = vadd.s32 %v234_v42, %v233_v41 }
 0x630   :  { %v237_v44 = vshrl.u32 %v235_v43, 16  ;;  %v236_v45 = vand.u32 65535, %v235_v43 }
 0x632   :  { %v239_v46 = vcvt.s32.f32 %v237_v44  ;;  %v238_v47 = vcvt.s32.f32 %v236_v45 }
 0x634   :  { %242 = vadd.xlane.f32.xlu0 %v239_v46  ;;  %240 = vadd.xlane.f32.xlu1 %v238_v47 }
 0x6c1   :  { %v243_v48 = vpop.xlane.xlu0 %242  ;;  %v241_v49 = vpop.xlane.xlu1 %240 }
 0x6c2   :  { %v245_v50 = vcvt.f32.s32 %v243_v48  ;;  %v244_v52 = vcvt.f32.s32 %v241_v49 }
 0x6c4   :  { %v246_v51 = vshll.u32 %v245_v50, 16 }
 0x6c6   :  { %v247_v53 = vadd.s32 %v246_v51, %v244_v52 }
 0x6c8   :  { %v248_v54 = vrot.slane %v247_v53, 4 }
 0x6ca   :  { %v249_v55 = vadd.s32 %v248_v54, %v247_v53 }
 0x6cc   :  { %v250_v56 = vrot.slane %v249_v55, 2 }
 0x6ce   :  { %v251_v57 = vadd.s32 %v250_v56, %v249_v55 }
 0x6d0   :  { %v252_v58 = vrot.slane %v251_v57, 1 }
 0x6d2   :  { %v253_v59 = vadd.s32 %v252_v58, %v251_v57 }
 0x6d4   :  { %988 = vpush %v253_v59 }
 0x705   :  { %s989_s30 = spop %988 }
 0x706   :  { %p255_p7 = scmp.ge.s32.totalorder %s989_s30, 512 }
 0x708   :  { %s1389_s29 = smov (!%p255_p7, %s229_s29), %s1387_s27 }
 0x709   :  { %s257_s3 = sor.u32 4194304, %s1389_s29 }
 0x70a   :  { %v258_v60 = vstv %s257_s3 }
 0x70b   :  { %vm259_vm2 = vcmp.ge.s32.totalorder %v1102_v16, %v258_v60  ;;  %vm260_vm3 = vcmp.ge.s32.totalorder %v1106_v17, %v258_v60 }
 0x70c   :  { %v261_v61 = vsel %vm259_vm2, 1, %v1068_v18  ;;  %v262_v62 = vsel %vm260_vm3, 1, %v1068_v18 }
 0x70d   :  { %v263_v63 = vadd.s32 %v262_v62, %v261_v61 }
 0x70f   :  { %v265_v0 = vshrl.u32 %v263_v63, 16  ;;  %v264_v1 = vand.u32 65535, %v263_v63 }
 0x711   :  { %v267_v2 = vcvt.s32.f32 %v265_v0  ;;  %v266_v3 = vcvt.s32.f32 %v264_v1 }
 0x713   :  { %270 = vadd.xlane.f32.xlu0 %v267_v2  ;;  %268 = vadd.xlane.f32.xlu1 %v266_v3 }
 0x7a0   :  { %v271_v4 = vpop.xlane.xlu0 %270  ;;  %v269_v5 = vpop.xlane.xlu1 %268 }
 0x7a1   :  { %v273_v6 = vcvt.f32.s32 %v271_v4  ;;  %v272_v8 = vcvt.f32.s32 %v269_v5 }
 0x7a3   :  { %v274_v7 = vshll.u32 %v273_v6, 16 }
 0x7a5   :  { %v275_v9 = vadd.s32 %v274_v7, %v272_v8 }
 0x7a7   :  { %v276_v10 = vrot.slane %v275_v9, 4 }
 0x7a9   :  { %v277_v12 = vadd.s32 %v276_v10, %v275_v9 }
 0x7ab   :  { %v278_v13 = vrot.slane %v277_v12, 2 }
 0x7ad   :  { %v279_v15 = vadd.s32 %v278_v13, %v277_v12 }
 0x7af   :  { %v280_v19 = vrot.slane %v279_v15, 1 }
 0x7b1   :  { %v281_v20 = vadd.s32 %v280_v19, %v279_v15 }
 0x7b3   :  { %990 = vpush %v281_v20 }
 0x7e4   :  { %s991_s4 = spop %990 }
 0x7e5   :  { %p283_p8 = scmp.ge.s32.totalorder %s991_s4, 512 }
 0x7e7   :  { %s1391_s3 = smov (!%p283_p8, %s257_s3), %s1389_s29 }
 0x7e8   :  { %s285_s5 = sor.u32 2097152, %s1391_s3 }
 0x7e9   :  { %v286_v21 = vstv %s285_s5 }
 0x7ea   :  { %vm287_vm4 = vcmp.ge.s32.totalorder %v1102_v16, %v286_v21  ;;  %vm288_vm5 = vcmp.ge.s32.totalorder %v1106_v17, %v286_v21 }
 0x7eb   :  { %v289_v22 = vsel %vm287_vm4, 1, %v1068_v18  ;;  %v290_v23 = vsel %vm288_vm5, 1, %v1068_v18 }
 0x7ec   :  { %v291_v24 = vadd.s32 %v290_v23, %v289_v22 }
 0x7ee   :  { %v293_v25 = vshrl.u32 %v291_v24, 16  ;;  %v292_v26 = vand.u32 65535, %v291_v24 }
 0x7f0   :  { %v295_v27 = vcvt.s32.f32 %v293_v25  ;;  %v294_v28 = vcvt.s32.f32 %v292_v26 }
 0x7f2   :  { %298 = vadd.xlane.f32.xlu0 %v295_v27  ;;  %296 = vadd.xlane.f32.xlu1 %v294_v28 }
 0x87f   :  { %v299_v29 = vpop.xlane.xlu0 %298  ;;  %v297_v30 = vpop.xlane.xlu1 %296 }
 0x880   :  { %v301_v31 = vcvt.f32.s32 %v299_v29  ;;  %v300_v33 = vcvt.f32.s32 %v297_v30 }
 0x882   :  { %v302_v32 = vshll.u32 %v301_v31, 16 }
 0x884   :  { %v303_v34 = vadd.s32 %v302_v32, %v300_v33 }
 0x886   :  { %v304_v35 = vrot.slane %v303_v34, 4 }
 0x888   :  { %v305_v36 = vadd.s32 %v304_v35, %v303_v34 }
 0x88a   :  { %v306_v37 = vrot.slane %v305_v36, 2 }
 0x88c   :  { %v307_v38 = vadd.s32 %v306_v37, %v305_v36 }
 0x88e   :  { %v308_v39 = vrot.slane %v307_v38, 1 }
 0x890   :  { %v309_v40 = vadd.s32 %v308_v39, %v307_v38 }
 0x892   :  { %992 = vpush %v309_v40 }
 0x8c3   :  { %s993_s6 = spop %992 }
 0x8c4   :  { %p311_p9 = scmp.ge.s32.totalorder %s993_s6, 512 }
 0x8c6   :  { %s1393_s5 = smov (!%p311_p9, %s285_s5), %s1391_s3 }
 0x8c7   :  { %s313_s7 = sor.u32 1048576, %s1393_s5 }
 0x8c8   :  { %v314_v41 = vstv %s313_s7 }
 0x8c9   :  { %vm315_vm6 = vcmp.ge.s32.totalorder %v1102_v16, %v314_v41  ;;  %vm316_vm7 = vcmp.ge.s32.totalorder %v1106_v17, %v314_v41 }
 0x8ca   :  { %v317_v42 = vsel %vm315_vm6, 1, %v1068_v18  ;;  %v318_v43 = vsel %vm316_vm7, 1, %v1068_v18 }
 0x8cb   :  { %v319_v44 = vadd.s32 %v318_v43, %v317_v42 }
 0x8cd   :  { %v321_v45 = vshrl.u32 %v319_v44, 16  ;;  %v320_v46 = vand.u32 65535, %v319_v44 }
 0x8cf   :  { %v323_v47 = vcvt.s32.f32 %v321_v45  ;;  %v322_v48 = vcvt.s32.f32 %v320_v46 }
 0x8d1   :  { %326 = vadd.xlane.f32.xlu0 %v323_v47  ;;  %324 = vadd.xlane.f32.xlu1 %v322_v48 }
 0x95e   :  { %v327_v49 = vpop.xlane.xlu0 %326  ;;  %v325_v50 = vpop.xlane.xlu1 %324 }
 0x95f   :  { %v329_v51 = vcvt.f32.s32 %v327_v49  ;;  %v328_v53 = vcvt.f32.s32 %v325_v50 }
 0x961   :  { %v330_v52 = vshll.u32 %v329_v51, 16 }
 0x963   :  { %v331_v54 = vadd.s32 %v330_v52, %v328_v53 }
 0x965   :  { %v332_v55 = vrot.slane %v331_v54, 4 }
 0x967   :  { %v333_v56 = vadd.s32 %v332_v55, %v331_v54 }
 0x969   :  { %v334_v57 = vrot.slane %v333_v56, 2 }
 0x96b   :  { %v335_v58 = vadd.s32 %v334_v57, %v333_v56 }
 0x96d   :  { %v336_v59 = vrot.slane %v335_v58, 1 }
 0x96f   :  { %v337_v60 = vadd.s32 %v336_v59, %v335_v58 }
 0x971   :  { %994 = vpush %v337_v60 }
 0x9a2   :  { %s995_s8 = spop %994 }
 0x9a3   :  { %p339_p10 = scmp.ge.s32.totalorder %s995_s8, 512 }
 0x9a5   :  { %s1395_s7 = smov (!%p339_p10, %s313_s7), %s1393_s5 }
 0x9a6   :  { %s341_s9 = sor.u32 524288, %s1395_s7 }
 0x9a7   :  { %v342_v61 = vstv %s341_s9 }
 0x9a8   :  { %vm343_vm8 = vcmp.ge.s32.totalorder %v1102_v16, %v342_v61  ;;  %vm344_vm9 = vcmp.ge.s32.totalorder %v1106_v17, %v342_v61 }
 0x9a9   :  { %v345_v62 = vsel %vm343_vm8, 1, %v1068_v18  ;;  %v346_v63 = vsel %vm344_vm9, 1, %v1068_v18 }
 0x9aa   :  { %v347_v0 = vadd.s32 %v346_v63, %v345_v62 }
 0x9ac   :  { %v349_v1 = vshrl.u32 %v347_v0, 16  ;;  %v348_v2 = vand.u32 65535, %v347_v0 }
 0x9ae   :  { %v351_v3 = vcvt.s32.f32 %v349_v1  ;;  %v350_v4 = vcvt.s32.f32 %v348_v2 }
 0x9b0   :  { %354 = vadd.xlane.f32.xlu0 %v351_v3  ;;  %352 = vadd.xlane.f32.xlu1 %v350_v4 }
 0xa3d   :  { %v355_v5 = vpop.xlane.xlu0 %354  ;;  %v353_v6 = vpop.xlane.xlu1 %352 }
 0xa3e   :  { %v357_v7 = vcvt.f32.s32 %v355_v5  ;;  %v356_v9 = vcvt.f32.s32 %v353_v6 }
 0xa40   :  { %v358_v8 = vshll.u32 %v357_v7, 16 }
 0xa42   :  { %v359_v10 = vadd.s32 %v358_v8, %v356_v9 }
 0xa44   :  { %v360_v12 = vrot.slane %v359_v10, 4 }
 0xa46   :  { %v361_v13 = vadd.s32 %v360_v12, %v359_v10 }
 0xa48   :  { %v362_v15 = vrot.slane %v361_v13, 2 }
 0xa4a   :  { %v363_v19 = vadd.s32 %v362_v15, %v361_v13 }
 0xa4c   :  { %v364_v20 = vrot.slane %v363_v19, 1 }
 0xa4e   :  { %v365_v21 = vadd.s32 %v364_v20, %v363_v19 }
 0xa50   :  { %996 = vpush %v365_v21 }
 0xa81   :  { %s997_s10 = spop %996 }
 0xa82   :  { %p367_p11 = scmp.ge.s32.totalorder %s997_s10, 512 }
 0xa84   :  { %s1397_s9 = smov (!%p367_p11, %s341_s9), %s1395_s7 }
 0xa85   :  { %s369_s11 = sor.u32 262144, %s1397_s9 }
 0xa86   :  { %v370_v22 = vstv %s369_s11 }
 0xa87   :  { %vm371_vm10 = vcmp.ge.s32.totalorder %v1102_v16, %v370_v22  ;;  %vm372_vm11 = vcmp.ge.s32.totalorder %v1106_v17, %v370_v22 }
 0xa88   :  { %v373_v23 = vsel %vm371_vm10, 1, %v1068_v18  ;;  %v374_v24 = vsel %vm372_vm11, 1, %v1068_v18 }
 0xa89   :  { %v375_v25 = vadd.s32 %v374_v24, %v373_v23 }
 0xa8b   :  { %v377_v26 = vshrl.u32 %v375_v25, 16  ;;  %v376_v27 = vand.u32 65535, %v375_v25 }
 0xa8d   :  { %v379_v28 = vcvt.s32.f32 %v377_v26  ;;  %v378_v29 = vcvt.s32.f32 %v376_v27 }
 0xa8f   :  { %382 = vadd.xlane.f32.xlu0 %v379_v28  ;;  %380 = vadd.xlane.f32.xlu1 %v378_v29 }
 0xb1c   :  { %v383_v30 = vpop.xlane.xlu0 %382  ;;  %v381_v31 = vpop.xlane.xlu1 %380 }
 0xb1d   :  { %v385_v32 = vcvt.f32.s32 %v383_v30  ;;  %v384_v34 = vcvt.f32.s32 %v381_v31 }
 0xb1f   :  { %v386_v33 = vshll.u32 %v385_v32, 16 }
 0xb21   :  { %v387_v35 = vadd.s32 %v386_v33, %v384_v34 }
 0xb23   :  { %v388_v36 = vrot.slane %v387_v35, 4 }
 0xb25   :  { %v389_v37 = vadd.s32 %v388_v36, %v387_v35 }
 0xb27   :  { %v390_v38 = vrot.slane %v389_v37, 2 }
 0xb29   :  { %v391_v39 = vadd.s32 %v390_v38, %v389_v37 }
 0xb2b   :  { %v392_v40 = vrot.slane %v391_v39, 1 }
 0xb2d   :  { %v393_v41 = vadd.s32 %v392_v40, %v391_v39 }
 0xb2f   :  { %998 = vpush %v393_v41 }
 0xb60   :  { %s999_s12 = spop %998 }
 0xb61   :  { %p395_p12 = scmp.ge.s32.totalorder %s999_s12, 512 }
 0xb63   :  { %s1399_s11 = smov (!%p395_p12, %s369_s11), %s1397_s9 }
 0xb64   :  { %s397_s13 = sor.u32 131072, %s1399_s11 }
 0xb65   :  { %v398_v42 = vstv %s397_s13 }
 0xb66   :  { %vm399_vm12 = vcmp.ge.s32.totalorder %v1102_v16, %v398_v42  ;;  %vm400_vm13 = vcmp.ge.s32.totalorder %v1106_v17, %v398_v42 }
 0xb67   :  { %v401_v43 = vsel %vm399_vm12, 1, %v1068_v18  ;;  %v402_v44 = vsel %vm400_vm13, 1, %v1068_v18 }
 0xb68   :  { %v403_v45 = vadd.s32 %v402_v44, %v401_v43 }
 0xb6a   :  { %v405_v46 = vshrl.u32 %v403_v45, 16  ;;  %v404_v47 = vand.u32 65535, %v403_v45 }
 0xb6c   :  { %v407_v48 = vcvt.s32.f32 %v405_v46  ;;  %v406_v49 = vcvt.s32.f32 %v404_v47 }
 0xb6e   :  { %410 = vadd.xlane.f32.xlu0 %v407_v48  ;;  %408 = vadd.xlane.f32.xlu1 %v406_v49 }
 0xbfb   :  { %v411_v50 = vpop.xlane.xlu0 %410  ;;  %v409_v51 = vpop.xlane.xlu1 %408 }
 0xbfc   :  { %v413_v52 = vcvt.f32.s32 %v411_v50  ;;  %v412_v54 = vcvt.f32.s32 %v409_v51 }
 0xbfe   :  { %v414_v53 = vshll.u32 %v413_v52, 16 }
 0xc00   :  { %v415_v55 = vadd.s32 %v414_v53, %v412_v54 }
 0xc02   :  { %v416_v56 = vrot.slane %v415_v55, 4 }
 0xc04   :  { %v417_v57 = vadd.s32 %v416_v56, %v415_v55 }
 0xc06   :  { %v418_v58 = vrot.slane %v417_v57, 2 }
 0xc08   :  { %v419_v59 = vadd.s32 %v418_v58, %v417_v57 }
 0xc0a   :  { %v420_v60 = vrot.slane %v419_v59, 1 }
 0xc0c   :  { %v421_v61 = vadd.s32 %v420_v60, %v419_v59 }
 0xc0e   :  { %1000 = vpush %v421_v61 }
 0xc3f   :  { %s1001_s14 = spop %1000 }
 0xc40   :  { %p423_p13 = scmp.ge.s32.totalorder %s1001_s14, 512 }
 0xc42   :  { %s1401_s13 = smov (!%p423_p13, %s397_s13), %s1399_s11 }
 0xc43   :  { %s425_s15 = sor.u32 65536, %s1401_s13 }
 0xc44   :  { %v426_v62 = vstv %s425_s15 }
 0xc45   :  { %vm427_vm14 = vcmp.ge.s32.totalorder %v1102_v16, %v426_v62  ;;  %vm428_vm15 = vcmp.ge.s32.totalorder %v1106_v17, %v426_v62 }
 0xc46   :  { %v429_v63 = vsel %vm427_vm14, 1, %v1068_v18  ;;  %v430_v0 = vsel %vm428_vm15, 1, %v1068_v18 }
 0xc47   :  { %v431_v1 = vadd.s32 %v430_v0, %v429_v63 }
 0xc49   :  { %v433_v2 = vshrl.u32 %v431_v1, 16  ;;  %v432_v3 = vand.u32 65535, %v431_v1 }
 0xc4b   :  { %v435_v4 = vcvt.s32.f32 %v433_v2  ;;  %v434_v5 = vcvt.s32.f32 %v432_v3 }
 0xc4d   :  { %438 = vadd.xlane.f32.xlu0 %v435_v4  ;;  %436 = vadd.xlane.f32.xlu1 %v434_v5 }
 0xcda   :  { %v439_v6 = vpop.xlane.xlu0 %438  ;;  %v437_v7 = vpop.xlane.xlu1 %436 }
 0xcdb   :  { %v441_v8 = vcvt.f32.s32 %v439_v6  ;;  %v440_v10 = vcvt.f32.s32 %v437_v7 }
 0xcdd   :  { %v442_v9 = vshll.u32 %v441_v8, 16 }
 0xcdf   :  { %v443_v12 = vadd.s32 %v442_v9, %v440_v10 }
 0xce1   :  { %v444_v13 = vrot.slane %v443_v12, 4 }
 0xce3   :  { %v445_v15 = vadd.s32 %v444_v13, %v443_v12 }
 0xce5   :  { %v446_v19 = vrot.slane %v445_v15, 2 }
 0xce7   :  { %v447_v20 = vadd.s32 %v446_v19, %v445_v15 }
 0xce9   :  { %v448_v21 = vrot.slane %v447_v20, 1 }
 0xceb   :  { %v449_v22 = vadd.s32 %v448_v21, %v447_v20 }
 0xced   :  { %1002 = vpush %v449_v22 }
 0xd1e   :  { %s1003_s16 = spop %1002 }
 0xd1f   :  { %p451_p0 = scmp.ge.s32.totalorder %s1003_s16, 512 }
 0xd21   :  { %s1403_s15 = smov (!%p451_p0, %s425_s15), %s1401_s13 }
 0xd22   :  { %s453_s0 = sor.u32 32768, %s1403_s15 }
 0xd23   :  { %v454_v23 = vstv %s453_s0 }
 0xd24   :  { %vm455_vm0 = vcmp.ge.s32.totalorder %v1102_v16, %v454_v23  ;;  %vm456_vm1 = vcmp.ge.s32.totalorder %v1106_v17, %v454_v23 }
 0xd25   :  { %v457_v24 = vsel %vm455_vm0, 1, %v1068_v18  ;;  %v458_v25 = vsel %vm456_vm1, 1, %v1068_v18 }
 0xd26   :  { %v459_v26 = vadd.s32 %v458_v25, %v457_v24 }
 0xd28   :  { %v461_v27 = vshrl.u32 %v459_v26, 16  ;;  %v460_v28 = vand.u32 65535, %v459_v26 }
 0xd2a   :  { %v463_v29 = vcvt.s32.f32 %v461_v27  ;;  %v462_v30 = vcvt.s32.f32 %v460_v28 }
 0xd2c   :  { %466 = vadd.xlane.f32.xlu0 %v463_v29  ;;  %464 = vadd.xlane.f32.xlu1 %v462_v30 }
 0xdb9   :  { %v467_v31 = vpop.xlane.xlu0 %466  ;;  %v465_v32 = vpop.xlane.xlu1 %464 }
 0xdba   :  { %v469_v33 = vcvt.f32.s32 %v467_v31  ;;  %v468_v35 = vcvt.f32.s32 %v465_v32 }
 0xdbc   :  { %v470_v34 = vshll.u32 %v469_v33, 16 }
 0xdbe   :  { %v471_v36 = vadd.s32 %v470_v34, %v468_v35 }
 0xdc0   :  { %v472_v37 = vrot.slane %v471_v36, 4 }
 0xdc2   :  { %v473_v38 = vadd.s32 %v472_v37, %v471_v36 }
 0xdc4   :  { %v474_v39 = vrot.slane %v473_v38, 2 }
 0xdc6   :  { %v475_v40 = vadd.s32 %v474_v39, %v473_v38 }
 0xdc8   :  { %v476_v41 = vrot.slane %v475_v40, 1 }
 0xdca   :  { %v477_v42 = vadd.s32 %v476_v41, %v475_v40 }
 0xdcc   :  { %1004 = vpush %v477_v42 }
 0xdfd   :  { %s1005_s1 = spop %1004 }
 0xdfe   :  { %p479_p1 = scmp.ge.s32.totalorder %s1005_s1, 512 }
 0xe00   :  { %s1405_s0 = smov (!%p479_p1, %s453_s0), %s1403_s15 }
 0xe01   :  { %s481_s17 = sor.u32 16384, %s1405_s0 }
 0xe02   :  { %v482_v43 = vstv %s481_s17 }
 0xe03   :  { %vm483_vm2 = vcmp.ge.s32.totalorder %v1102_v16, %v482_v43  ;;  %vm484_vm3 = vcmp.ge.s32.totalorder %v1106_v17, %v482_v43 }
 0xe04   :  { %v485_v44 = vsel %vm483_vm2, 1, %v1068_v18  ;;  %v486_v45 = vsel %vm484_vm3, 1, %v1068_v18 }
 0xe05   :  { %v487_v46 = vadd.s32 %v486_v45, %v485_v44 }
 0xe07   :  { %v489_v47 = vshrl.u32 %v487_v46, 16  ;;  %v488_v48 = vand.u32 65535, %v487_v46 }
 0xe09   :  { %v491_v49 = vcvt.s32.f32 %v489_v47  ;;  %v490_v50 = vcvt.s32.f32 %v488_v48 }
 0xe0b   :  { %494 = vadd.xlane.f32.xlu0 %v491_v49  ;;  %492 = vadd.xlane.f32.xlu1 %v490_v50 }
 0xe98   :  { %v495_v51 = vpop.xlane.xlu0 %494  ;;  %v493_v52 = vpop.xlane.xlu1 %492 }
 0xe99   :  { %v497_v53 = vcvt.f32.s32 %v495_v51  ;;  %v496_v55 = vcvt.f32.s32 %v493_v52 }
 0xe9b   :  { %v498_v54 = vshll.u32 %v497_v53, 16 }
 0xe9d   :  { %v499_v56 = vadd.s32 %v498_v54, %v496_v55 }
 0xe9f   :  { %v500_v57 = vrot.slane %v499_v56, 4 }
 0xea1   :  { %v501_v58 = vadd.s32 %v500_v57, %v499_v56 }
 0xea3   :  { %v502_v59 = vrot.slane %v501_v58, 2 }
 0xea5   :  { %v503_v60 = vadd.s32 %v502_v59, %v501_v58 }
 0xea7   :  { %v504_v61 = vrot.slane %v503_v60, 1 }
 0xea9   :  { %v505_v62 = vadd.s32 %v504_v61, %v503_v60 }
 0xeab   :  { %1006 = vpush %v505_v62 }
 0xedc   :  { %s1007_s18 = spop %1006 }
 0xedd   :  { %p507_p2 = scmp.ge.s32.totalorder %s1007_s18, 512 }
 0xedf   :  { %s1407_s17 = smov (!%p507_p2, %s481_s17), %s1405_s0 }
 0xee0   :  { %s509_s19 = sor.u32 8192, %s1407_s17 }
 0xee1   :  { %v510_v63 = vstv %s509_s19 }
 0xee2   :  { %vm511_vm4 = vcmp.ge.s32.totalorder %v1102_v16, %v510_v63  ;;  %vm512_vm5 = vcmp.ge.s32.totalorder %v1106_v17, %v510_v63 }
 0xee3   :  { %v513_v0 = vsel %vm511_vm4, 1, %v1068_v18  ;;  %v514_v1 = vsel %vm512_vm5, 1, %v1068_v18 }
 0xee4   :  { %v515_v2 = vadd.s32 %v514_v1, %v513_v0 }
 0xee6   :  { %v517_v3 = vshrl.u32 %v515_v2, 16  ;;  %v516_v4 = vand.u32 65535, %v515_v2 }
 0xee8   :  { %v519_v5 = vcvt.s32.f32 %v517_v3  ;;  %v518_v6 = vcvt.s32.f32 %v516_v4 }
 0xeea   :  { %522 = vadd.xlane.f32.xlu0 %v519_v5  ;;  %520 = vadd.xlane.f32.xlu1 %v518_v6 }
 0xf77   :  { %v523_v7 = vpop.xlane.xlu0 %522  ;;  %v521_v8 = vpop.xlane.xlu1 %520 }
 0xf78   :  { %v525_v9 = vcvt.f32.s32 %v523_v7  ;;  %v524_v12 = vcvt.f32.s32 %v521_v8 }
 0xf7a   :  { %v526_v10 = vshll.u32 %v525_v9, 16 }
 0xf7c   :  { %v527_v13 = vadd.s32 %v526_v10, %v524_v12 }
 0xf7e   :  { %v528_v15 = vrot.slane %v527_v13, 4 }
 0xf80   :  { %v529_v19 = vadd.s32 %v528_v15, %v527_v13 }
 0xf82   :  { %v530_v20 = vrot.slane %v529_v19, 2 }
 0xf84   :  { %v531_v21 = vadd.s32 %v530_v20, %v529_v19 }
 0xf86   :  { %v532_v22 = vrot.slane %v531_v21, 1 }
 0xf88   :  { %v533_v23 = vadd.s32 %v532_v22, %v531_v21 }
 0xf8a   :  { %1008 = vpush %v533_v23 }
 0xfbb   :  { %s1009_s20 = spop %1008 }
 0xfbc   :  { %p535_p3 = scmp.ge.s32.totalorder %s1009_s20, 512 }
 0xfbe   :  { %s1409_s19 = smov (!%p535_p3, %s509_s19), %s1407_s17 }
 0xfbf   :  { %s537_s21 = sor.u32 4096, %s1409_s19 }
 0xfc0   :  { %v538_v24 = vstv %s537_s21 }
 0xfc1   :  { %vm539_vm6 = vcmp.ge.s32.totalorder %v1102_v16, %v538_v24  ;;  %vm540_vm7 = vcmp.ge.s32.totalorder %v1106_v17, %v538_v24 }
 0xfc2   :  { %v541_v25 = vsel %vm539_vm6, 1, %v1068_v18  ;;  %v542_v26 = vsel %vm540_vm7, 1, %v1068_v18 }
 0xfc3   :  { %v543_v27 = vadd.s32 %v542_v26, %v541_v25 }
 0xfc5   :  { %v545_v28 = vshrl.u32 %v543_v27, 16  ;;  %v544_v29 = vand.u32 65535, %v543_v27 }
 0xfc7   :  { %v547_v30 = vcvt.s32.f32 %v545_v28  ;;  %v546_v31 = vcvt.s32.f32 %v544_v29 }
 0xfc9   :  { %550 = vadd.xlane.f32.xlu0 %v547_v30  ;;  %548 = vadd.xlane.f32.xlu1 %v546_v31 }
0x1056   :  { %v551_v32 = vpop.xlane.xlu0 %550  ;;  %v549_v33 = vpop.xlane.xlu1 %548 }
0x1057   :  { %v553_v34 = vcvt.f32.s32 %v551_v32  ;;  %v552_v36 = vcvt.f32.s32 %v549_v33 }
0x1059   :  { %v554_v35 = vshll.u32 %v553_v34, 16 }
0x105b   :  { %v555_v37 = vadd.s32 %v554_v35, %v552_v36 }
0x105d   :  { %v556_v38 = vrot.slane %v555_v37, 4 }
0x105f   :  { %v557_v39 = vadd.s32 %v556_v38, %v555_v37 }
0x1061   :  { %v558_v40 = vrot.slane %v557_v39, 2 }
0x1063   :  { %v559_v41 = vadd.s32 %v558_v40, %v557_v39 }
0x1065   :  { %v560_v42 = vrot.slane %v559_v41, 1 }
0x1067   :  { %v561_v43 = vadd.s32 %v560_v42, %v559_v41 }
0x1069   :  { %1010 = vpush %v561_v43 }
0x109a   :  { %s1011_s22 = spop %1010 }
0x109b   :  { %p563_p4 = scmp.ge.s32.totalorder %s1011_s22, 512 }
0x109d   :  { %s1411_s21 = smov (!%p563_p4, %s537_s21), %s1409_s19 }
0x109e   :  { %s565_s23 = sor.u32 2048, %s1411_s21 }
0x109f   :  { %v566_v44 = vstv %s565_s23 }
0x10a0   :  { %vm567_vm8 = vcmp.ge.s32.totalorder %v1102_v16, %v566_v44  ;;  %vm568_vm9 = vcmp.ge.s32.totalorder %v1106_v17, %v566_v44 }
0x10a1   :  { %v569_v45 = vsel %vm567_vm8, 1, %v1068_v18  ;;  %v570_v46 = vsel %vm568_vm9, 1, %v1068_v18 }
0x10a2   :  { %v571_v47 = vadd.s32 %v570_v46, %v569_v45 }
0x10a4   :  { %v573_v48 = vshrl.u32 %v571_v47, 16  ;;  %v572_v49 = vand.u32 65535, %v571_v47 }
0x10a6   :  { %v575_v50 = vcvt.s32.f32 %v573_v48  ;;  %v574_v51 = vcvt.s32.f32 %v572_v49 }
0x10a8   :  { %578 = vadd.xlane.f32.xlu0 %v575_v50  ;;  %576 = vadd.xlane.f32.xlu1 %v574_v51 }
0x1135   :  { %v579_v52 = vpop.xlane.xlu0 %578  ;;  %v577_v53 = vpop.xlane.xlu1 %576 }
0x1136   :  { %v581_v54 = vcvt.f32.s32 %v579_v52  ;;  %v580_v56 = vcvt.f32.s32 %v577_v53 }
0x1138   :  { %v582_v55 = vshll.u32 %v581_v54, 16 }
0x113a   :  { %v583_v57 = vadd.s32 %v582_v55, %v580_v56 }
0x113c   :  { %v584_v58 = vrot.slane %v583_v57, 4 }
0x113e   :  { %v585_v59 = vadd.s32 %v584_v58, %v583_v57 }
0x1140   :  { %v586_v60 = vrot.slane %v585_v59, 2 }
0x1142   :  { %v587_v61 = vadd.s32 %v586_v60, %v585_v59 }
0x1144   :  { %v588_v62 = vrot.slane %v587_v61, 1 }
0x1146   :  { %v589_v63 = vadd.s32 %v588_v62, %v587_v61 }
0x1148   :  { %1012 = vpush %v589_v63 }
0x1179   :  { %s1013_s24 = spop %1012 }
0x117a   :  { %p591_p5 = scmp.ge.s32.totalorder %s1013_s24, 512  ;;  %s1069_s24 = smov [#allocation2]  }
0x117c   :  { %s1413_s23 = smov (!%p591_p5, %s565_s23), %s1411_s21 }
0x117d   :  { %s593_s25 = sor.u32 1024, %s1413_s23 }
0x117e   :  { %v594_v0 = vstv %s593_s25 }
0x117f   :  { %vm595_vm10 = vcmp.ge.s32.totalorder %v1102_v16, %v594_v0  ;;  %vm596_vm11 = vcmp.ge.s32.totalorder %v1106_v17, %v594_v0 }
0x1180   :  { %v597_v1 = vsel %vm595_vm10, 1, %v1068_v18  ;;  %v598_v2 = vsel %vm596_vm11, 1, %v1068_v18 }
0x1181   :  { %v599_v3 = vadd.s32 %v598_v2, %v597_v1 }
0x1183   :  { %v601_v4 = vshrl.u32 %v599_v3, 16  ;;  %v600_v5 = vand.u32 65535, %v599_v3 }
0x1185   :  { %v603_v6 = vcvt.s32.f32 %v601_v4  ;;  %v602_v7 = vcvt.s32.f32 %v600_v5 }
0x1187   :  { %606 = vadd.xlane.f32.xlu0 %v603_v6  ;;  %604 = vadd.xlane.f32.xlu1 %v602_v7 }
0x1214   :  { %v607_v8 = vpop.xlane.xlu0 %606  ;;  %v605_v9 = vpop.xlane.xlu1 %604 }
0x1215   :  { %v609_v10 = vcvt.f32.s32 %v607_v8  ;;  %v608_v13 = vcvt.f32.s32 %v605_v9 }
0x1217   :  { %v610_v12 = vshll.u32 %v609_v10, 16 }
0x1219   :  { %v611_v15 = vadd.s32 %v610_v12, %v608_v13 }
0x121b   :  { %v612_v19 = vrot.slane %v611_v15, 4 }
0x121d   :  { %v613_v20 = vadd.s32 %v612_v19, %v611_v15 }
0x121f   :  { %v614_v21 = vrot.slane %v613_v20, 2 }
0x1221   :  { %v615_v22 = vadd.s32 %v614_v21, %v613_v20 }
0x1223   :  { %v616_v23 = vrot.slane %v615_v22, 1 }
0x1225   :  { %v617_v24 = vadd.s32 %v616_v23, %v615_v22 }
0x1227   :  { %1014 = vpush %v617_v24 }
0x1258   :  { %s1015_s26 = spop %1014 }
0x1259   :  { %p619_p6 = scmp.ge.s32.totalorder %s1015_s26, 512 }
0x125b   :  { %s1415_s25 = smov (!%p619_p6, %s593_s25), %s1413_s23 }
0x125c   :  { %s621_s27 = sor.u32 512, %s1415_s25 }
0x125d   :  { %v622_v25 = vstv %s621_s27 }
0x125e   :  { %vm623_vm12 = vcmp.ge.s32.totalorder %v1102_v16, %v622_v25  ;;  %vm624_vm13 = vcmp.ge.s32.totalorder %v1106_v17, %v622_v25 }
0x125f   :  { %v625_v26 = vsel %vm623_vm12, 1, %v1068_v18  ;;  %v626_v27 = vsel %vm624_vm13, 1, %v1068_v18 }
0x1260   :  { %v627_v28 = vadd.s32 %v626_v27, %v625_v26 }
0x1262   :  { %v629_v29 = vshrl.u32 %v627_v28, 16  ;;  %v628_v30 = vand.u32 65535, %v627_v28 }
0x1264   :  { %v631_v31 = vcvt.s32.f32 %v629_v29  ;;  %v630_v32 = vcvt.s32.f32 %v628_v30 }
0x1266   :  { %634 = vadd.xlane.f32.xlu0 %v631_v31  ;;  %632 = vadd.xlane.f32.xlu1 %v630_v32 }
0x12f3   :  { %v635_v33 = vpop.xlane.xlu0 %634  ;;  %v633_v34 = vpop.xlane.xlu1 %632 }
0x12f4   :  { %v637_v35 = vcvt.f32.s32 %v635_v33  ;;  %v636_v37 = vcvt.f32.s32 %v633_v34 }
0x12f6   :  { %v638_v36 = vshll.u32 %v637_v35, 16 }
0x12f8   :  { %v639_v38 = vadd.s32 %v638_v36, %v636_v37 }
0x12fa   :  { %v640_v39 = vrot.slane %v639_v38, 4 }
0x12fc   :  { %v641_v40 = vadd.s32 %v640_v39, %v639_v38 }
0x12fe   :  { %v642_v41 = vrot.slane %v641_v40, 2 }
0x1300   :  { %v643_v42 = vadd.s32 %v642_v41, %v641_v40 }
0x1302   :  { %v644_v43 = vrot.slane %v643_v42, 1 }
0x1304   :  { %v645_v44 = vadd.s32 %v644_v43, %v643_v42 }
0x1306   :  { %1016 = vpush %v645_v44 }
0x1337   :  { %s1017_s28 = spop %1016 }
0x1338   :  { %p647_p7 = scmp.ge.s32.totalorder %s1017_s28, 512 }
0x133a   :  { %s1417_s27 = smov (!%p647_p7, %s621_s27), %s1415_s25  ;;  %s966_s25 = sshll.u32 %s1069_s24, 4  ;;  %s967_s25 = int_to_ptr.vmem [resolvable:$true] %s966_s25 }
0x133b   :  { %s649_s29 = sor.u32 256, %s1417_s27  ;;  %s1048_s28 = scalar_lea.vmem %s967_s25, 32 }
0x133c   :  { %v650_v45 = vstv %s649_s29  ;;  %p1049_p4 = scmp.lt.s32.totalorder %s967_s25, %s967_s25 }
0x133d   :  { %vm651_vm14 = vcmp.ge.s32.totalorder %v1102_v16, %v650_v45  ;;  %vm652_vm15 = vcmp.ge.s32.totalorder %v1106_v17, %v650_v45 }
0x133e   :  { %v653_v46 = vsel %vm651_vm14, 1, %v1068_v18  ;;  %v654_v47 = vsel %vm652_vm15, 1, %v1068_v18 }
0x133f   :  { %v655_v48 = vadd.s32 %v654_v47, %v653_v46 }
0x1341   :  { %v657_v49 = vshrl.u32 %v655_v48, 16  ;;  %v656_v50 = vand.u32 65535, %v655_v48 }
0x1343   :  { %v659_v51 = vcvt.s32.f32 %v657_v49  ;;  %v658_v52 = vcvt.s32.f32 %v656_v50 }
0x1345   :  { %662 = vadd.xlane.f32.xlu0 %v659_v51  ;;  %660 = vadd.xlane.f32.xlu1 %v658_v52 }
0x13d2   :  { %v663_v53 = vpop.xlane.xlu0 %662  ;;  %v661_v54 = vpop.xlane.xlu1 %660 }
0x13d3   :  { %v665_v55 = vcvt.f32.s32 %v663_v53  ;;  %v664_v57 = vcvt.f32.s32 %v661_v54 }
0x13d5   :  { %v666_v56 = vshll.u32 %v665_v55, 16 }
0x13d7   :  { %v667_v58 = vadd.s32 %v666_v56, %v664_v57 }
0x13d9   :  { %v668_v59 = vrot.slane %v667_v58, 4 }
0x13db   :  { %v669_v60 = vadd.s32 %v668_v59, %v667_v58 }
0x13dd   :  { %v670_v61 = vrot.slane %v669_v60, 2 }
0x13df   :  { %v671_v62 = vadd.s32 %v670_v61, %v669_v60 }
0x13e1   :  { %v672_v63 = vrot.slane %v671_v62, 1 }
0x13e3   :  { %v673_v0 = vadd.s32 %v672_v63, %v671_v62 }
0x13e5   :  { %1018 = vpush %v673_v0 }
0x1416   :  { %s1019_s30 = spop %1018 }
0x1417   :  { %p675_p8 = scmp.ge.s32.totalorder %s1019_s30, 512 }
0x1419   :  { %s1419_s29 = smov (!%p675_p8, %s649_s29), %s1417_s27  ;;  %s1044_s27 = scalar_lea.vmem %s967_s25, 16 }
0x141a   :  { %s677_s3 = sor.u32 128, %s1419_s29  ;;  %p1045_p3 = scmp.ne.s32.totalorder %s967_s25, %s1044_s27 }
0x141b   :  { %v678_v1 = vstv %s677_s3  ;;  %p1050_p5 = scmp.lt.s32.totalorder %s1048_s28, %s1044_s27 }
0x141c   :  { %vm679_vm0 = vcmp.ge.s32.totalorder %v1102_v16, %v678_v1  ;;  %vm680_vm1 = vcmp.ge.s32.totalorder %v1106_v17, %v678_v1 }
0x141d   :  { %v681_v2 = vsel %vm679_vm0, 1, %v1068_v18  ;;  %v682_v3 = vsel %vm680_vm1, 1, %v1068_v18  ;;  %p1051_p6 = por %p1050_p5, %p1049_p4 }
0x141e   :  { %v683_v4 = vadd.s32 %v682_v3, %v681_v2 }
0x141f   :  { %p1052_p7 = pnand %p1051_p6, %p1045_p3 }
0x1420   :  { %v685_v5 = vshrl.u32 %v683_v4, 16  ;;  %v684_v6 = vand.u32 65535, %v683_v4 }
0x1422   :  { %v687_v7 = vcvt.s32.f32 %v685_v5  ;;  %v686_v8 = vcvt.s32.f32 %v684_v6 }
0x1424   :  { %690 = vadd.xlane.f32.xlu0 %v687_v7  ;;  %688 = vadd.xlane.f32.xlu1 %v686_v8 }
0x14b1   :  { %v691_v9 = vpop.xlane.xlu0 %690  ;;  %v689_v10 = vpop.xlane.xlu1 %688 }
0x14b2   :  { %v693_v12 = vcvt.f32.s32 %v691_v9  ;;  %v692_v15 = vcvt.f32.s32 %v689_v10 }
0x14b4   :  { %v694_v13 = vshll.u32 %v693_v12, 16 }
0x14b6   :  { %v695_v19 = vadd.s32 %v694_v13, %v692_v15 }
0x14b8   :  { %v696_v20 = vrot.slane %v695_v19, 4 }
0x14ba   :  { %v697_v21 = vadd.s32 %v696_v20, %v695_v19 }
0x14bc   :  { %v698_v22 = vrot.slane %v697_v21, 2 }
0x14be   :  { %v699_v23 = vadd.s32 %v698_v22, %v697_v21 }
0x14c0   :  { %v700_v24 = vrot.slane %v699_v23, 1 }
0x14c2   :  { %v701_v25 = vadd.s32 %v700_v24, %v699_v23 }
0x14c4   :  { %1020 = vpush %v701_v25 }
0x14f5   :  { %s1021_s4 = spop %1020 }
0x14f6   :  { %p703_p9 = scmp.ge.s32.totalorder %s1021_s4, 512 }
0x14f8   :  { %s1421_s3 = smov (!%p703_p9, %s677_s3), %s1419_s29 }
0x14f9   :  { %s705_s5 = sor.u32 64, %s1421_s3 }
0x14fa   :  { %v706_v26 = vstv %s705_s5 }
0x14fb   :  { %vm707_vm2 = vcmp.ge.s32.totalorder %v1102_v16, %v706_v26  ;;  %vm708_vm3 = vcmp.ge.s32.totalorder %v1106_v17, %v706_v26 }
0x14fc   :  { %v709_v27 = vsel %vm707_vm2, 1, %v1068_v18  ;;  %v710_v28 = vsel %vm708_vm3, 1, %v1068_v18 }
0x14fd   :  { %v711_v29 = vadd.s32 %v710_v28, %v709_v27 }
0x14ff   :  { %v713_v30 = vshrl.u32 %v711_v29, 16  ;;  %v712_v31 = vand.u32 65535, %v711_v29 }
0x1501   :  { %v715_v32 = vcvt.s32.f32 %v713_v30  ;;  %v714_v33 = vcvt.s32.f32 %v712_v31 }
0x1503   :  { %718 = vadd.xlane.f32.xlu0 %v715_v32  ;;  %716 = vadd.xlane.f32.xlu1 %v714_v33 }
0x1590   :  { %v719_v34 = vpop.xlane.xlu0 %718  ;;  %v717_v35 = vpop.xlane.xlu1 %716 }
0x1591   :  { %v721_v36 = vcvt.f32.s32 %v719_v34  ;;  %v720_v38 = vcvt.f32.s32 %v717_v35 }
0x1593   :  { %v722_v37 = vshll.u32 %v721_v36, 16 }
0x1595   :  { %v723_v39 = vadd.s32 %v722_v37, %v720_v38 }
0x1597   :  { %v724_v40 = vrot.slane %v723_v39, 4 }
0x1599   :  { %v725_v41 = vadd.s32 %v724_v40, %v723_v39 }
0x159b   :  { %v726_v42 = vrot.slane %v725_v41, 2 }
0x159d   :  { %v727_v43 = vadd.s32 %v726_v42, %v725_v41 }
0x159f   :  { %v728_v44 = vrot.slane %v727_v43, 1 }
0x15a1   :  { %v729_v45 = vadd.s32 %v728_v44, %v727_v43 }
0x15a3   :  { %1022 = vpush %v729_v45 }
0x15d4   :  { %s1023_s6 = spop %1022 }
0x15d5   :  { %p731_p10 = scmp.ge.s32.totalorder %s1023_s6, 512 }
0x15d7   :  { %s1423_s5 = smov (!%p731_p10, %s705_s5), %s1421_s3 }
0x15d8   :  { %s733_s7 = sor.u32 32, %s1423_s5 }
0x15d9   :  { %v734_v46 = vstv %s733_s7 }
0x15da   :  { %vm735_vm4 = vcmp.ge.s32.totalorder %v1102_v16, %v734_v46  ;;  %vm736_vm5 = vcmp.ge.s32.totalorder %v1106_v17, %v734_v46 }
0x15db   :  { %v737_v47 = vsel %vm735_vm4, 1, %v1068_v18  ;;  %v738_v48 = vsel %vm736_vm5, 1, %v1068_v18 }
0x15dc   :  { %v739_v49 = vadd.s32 %v738_v48, %v737_v47 }
0x15de   :  { %v741_v50 = vshrl.u32 %v739_v49, 16  ;;  %v740_v51 = vand.u32 65535, %v739_v49 }
0x15e0   :  { %v743_v52 = vcvt.s32.f32 %v741_v50  ;;  %v742_v53 = vcvt.s32.f32 %v740_v51 }
0x15e2   :  { %746 = vadd.xlane.f32.xlu0 %v743_v52  ;;  %744 = vadd.xlane.f32.xlu1 %v742_v53 }
0x166f   :  { %v747_v54 = vpop.xlane.xlu0 %746  ;;  %v745_v55 = vpop.xlane.xlu1 %744 }
0x1670   :  { %v749_v56 = vcvt.f32.s32 %v747_v54  ;;  %v748_v58 = vcvt.f32.s32 %v745_v55 }
0x1672   :  { %v750_v57 = vshll.u32 %v749_v56, 16 }
0x1674   :  { %v751_v59 = vadd.s32 %v750_v57, %v748_v58 }
0x1676   :  { %v752_v60 = vrot.slane %v751_v59, 4 }
0x1678   :  { %v753_v61 = vadd.s32 %v752_v60, %v751_v59 }
0x167a   :  { %v754_v62 = vrot.slane %v753_v61, 2 }
0x167c   :  { %v755_v63 = vadd.s32 %v754_v62, %v753_v61 }
0x167e   :  { %v756_v0 = vrot.slane %v755_v63, 1 }
0x1680   :  { %v757_v1 = vadd.s32 %v756_v0, %v755_v63 }
0x1682   :  { %1024 = vpush %v757_v1 }
0x16b3   :  { %s1025_s8 = spop %1024 }
0x16b4   :  { %p759_p11 = scmp.ge.s32.totalorder %s1025_s8, 512 }
0x16b6   :  { %s1425_s7 = smov (!%p759_p11, %s733_s7), %s1423_s5 }
0x16b7   :  { %s761_s9 = sor.u32 16, %s1425_s7 }
0x16b8   :  { %v762_v2 = vstv %s761_s9 }
0x16b9   :  { %vm763_vm6 = vcmp.ge.s32.totalorder %v1102_v16, %v762_v2  ;;  %vm764_vm7 = vcmp.ge.s32.totalorder %v1106_v17, %v762_v2 }
0x16ba   :  { %v765_v3 = vsel %vm763_vm6, 1, %v1068_v18  ;;  %v766_v4 = vsel %vm764_vm7, 1, %v1068_v18 }
0x16bb   :  { %v767_v5 = vadd.s32 %v766_v4, %v765_v3 }
0x16bd   :  { %v769_v6 = vshrl.u32 %v767_v5, 16  ;;  %v768_v7 = vand.u32 65535, %v767_v5 }
0x16bf   :  { %v771_v8 = vcvt.s32.f32 %v769_v6  ;;  %v770_v9 = vcvt.s32.f32 %v768_v7 }
0x16c1   :  { %774 = vadd.xlane.f32.xlu0 %v771_v8  ;;  %772 = vadd.xlane.f32.xlu1 %v770_v9 }
0x174e   :  { %v775_v10 = vpop.xlane.xlu0 %774  ;;  %v773_v12 = vpop.xlane.xlu1 %772 }
0x174f   :  { %v777_v13 = vcvt.f32.s32 %v775_v10  ;;  %v776_v19 = vcvt.f32.s32 %v773_v12 }
0x1751   :  { %v778_v15 = vshll.u32 %v777_v13, 16 }
0x1753   :  { %v779_v20 = vadd.s32 %v778_v15, %v776_v19 }
0x1755   :  { %v780_v21 = vrot.slane %v779_v20, 4 }
0x1757   :  { %v781_v22 = vadd.s32 %v780_v21, %v779_v20 }
0x1759   :  { %v782_v23 = vrot.slane %v781_v22, 2 }
0x175b   :  { %v783_v24 = vadd.s32 %v782_v23, %v781_v22 }
0x175d   :  { %v784_v25 = vrot.slane %v783_v24, 1 }
0x175f   :  { %v785_v26 = vadd.s32 %v784_v25, %v783_v24 }
0x1761   :  { %1026 = vpush %v785_v26 }
0x1792   :  { %s1027_s10 = spop %1026 }
0x1793   :  { %p787_p12 = scmp.ge.s32.totalorder %s1027_s10, 512 }
0x1795   :  { %s1427_s9 = smov (!%p787_p12, %s761_s9), %s1425_s7 }
0x1796   :  { %s789_s11 = sor.u32 8, %s1427_s9 }
0x1797   :  { %v790_v27 = vstv %s789_s11 }
0x1798   :  { %vm791_vm8 = vcmp.ge.s32.totalorder %v1102_v16, %v790_v27  ;;  %vm792_vm9 = vcmp.ge.s32.totalorder %v1106_v17, %v790_v27 }
0x1799   :  { %v793_v28 = vsel %vm791_vm8, 1, %v1068_v18  ;;  %v794_v29 = vsel %vm792_vm9, 1, %v1068_v18 }
0x179a   :  { %v795_v30 = vadd.s32 %v794_v29, %v793_v28 }
0x179c   :  { %v797_v31 = vshrl.u32 %v795_v30, 16  ;;  %v796_v32 = vand.u32 65535, %v795_v30 }
0x179e   :  { %v799_v33 = vcvt.s32.f32 %v797_v31  ;;  %v798_v34 = vcvt.s32.f32 %v796_v32 }
0x17a0   :  { %802 = vadd.xlane.f32.xlu0 %v799_v33  ;;  %800 = vadd.xlane.f32.xlu1 %v798_v34 }
0x182d   :  { %v803_v35 = vpop.xlane.xlu0 %802  ;;  %v801_v36 = vpop.xlane.xlu1 %800 }
0x182e   :  { %v805_v37 = vcvt.f32.s32 %v803_v35  ;;  %v804_v39 = vcvt.f32.s32 %v801_v36 }
0x1830   :  { %v806_v38 = vshll.u32 %v805_v37, 16 }
0x1832   :  { %v807_v40 = vadd.s32 %v806_v38, %v804_v39 }
0x1834   :  { %v808_v41 = vrot.slane %v807_v40, 4 }
0x1836   :  { %v809_v42 = vadd.s32 %v808_v41, %v807_v40 }
0x1838   :  { %v810_v43 = vrot.slane %v809_v42, 2 }
0x183a   :  { %v811_v44 = vadd.s32 %v810_v43, %v809_v42 }
0x183c   :  { %v812_v45 = vrot.slane %v811_v44, 1 }
0x183e   :  { %v813_v46 = vadd.s32 %v812_v45, %v811_v44 }
0x1840   :  { %1028 = vpush %v813_v46 }
0x1871   :  { %s1029_s12 = spop %1028 }
0x1872   :  { %p815_p13 = scmp.ge.s32.totalorder %s1029_s12, 512 }
0x1874   :  { %s1429_s11 = smov (!%p815_p13, %s789_s11), %s1427_s9 }
0x1875   :  { %s817_s13 = sor.u32 4, %s1429_s11 }
0x1876   :  { %v818_v47 = vstv %s817_s13 }
0x1877   :  { %vm819_vm10 = vcmp.ge.s32.totalorder %v1102_v16, %v818_v47  ;;  %vm820_vm11 = vcmp.ge.s32.totalorder %v1106_v17, %v818_v47 }
0x1878   :  { %v821_v48 = vsel %vm819_vm10, 1, %v1068_v18  ;;  %v822_v49 = vsel %vm820_vm11, 1, %v1068_v18 }
0x1879   :  { %v823_v50 = vadd.s32 %v822_v49, %v821_v48 }
0x187b   :  { %v825_v51 = vshrl.u32 %v823_v50, 16  ;;  %v824_v52 = vand.u32 65535, %v823_v50 }
0x187d   :  { %v827_v53 = vcvt.s32.f32 %v825_v51  ;;  %v826_v54 = vcvt.s32.f32 %v824_v52 }
0x187f   :  { %830 = vadd.xlane.f32.xlu0 %v827_v53  ;;  %828 = vadd.xlane.f32.xlu1 %v826_v54 }
0x190c   :  { %v831_v55 = vpop.xlane.xlu0 %830  ;;  %v829_v56 = vpop.xlane.xlu1 %828 }
0x190d   :  { %v833_v57 = vcvt.f32.s32 %v831_v55  ;;  %v832_v59 = vcvt.f32.s32 %v829_v56 }
0x190f   :  { %v834_v58 = vshll.u32 %v833_v57, 16 }
0x1911   :  { %v835_v60 = vadd.s32 %v834_v58, %v832_v59 }
0x1913   :  { %v836_v61 = vrot.slane %v835_v60, 4 }
0x1915   :  { %v837_v62 = vadd.s32 %v836_v61, %v835_v60 }
0x1917   :  { %v838_v63 = vrot.slane %v837_v62, 2 }
0x1919   :  { %v839_v0 = vadd.s32 %v838_v63, %v837_v62 }
0x191b   :  { %v840_v1 = vrot.slane %v839_v0, 1 }
0x191d   :  { %v841_v2 = vadd.s32 %v840_v1, %v839_v0 }
0x191f   :  { %1030 = vpush %v841_v2 }
0x1950   :  { %s1031_s14 = spop %1030 }
0x1951   :  { %p843_p0 = scmp.ge.s32.totalorder %s1031_s14, 512 }
0x1953   :  { %s1431_s13 = smov (!%p843_p0, %s817_s13), %s1429_s11 }
0x1954   :  { %s845_s15 = sor.u32 2, %s1431_s13 }
0x1955   :  { %v846_v3 = vstv %s845_s15 }
0x1956   :  { %vm847_vm12 = vcmp.ge.s32.totalorder %v1102_v16, %v846_v3  ;;  %vm848_vm13 = vcmp.ge.s32.totalorder %v1106_v17, %v846_v3 }
0x1957   :  { %v849_v4 = vsel %vm847_vm12, 1, %v1068_v18  ;;  %v850_v5 = vsel %vm848_vm13, 1, %v1068_v18 }
0x1958   :  { %v851_v6 = vadd.s32 %v850_v5, %v849_v4 }
0x195a   :  { %v853_v7 = vshrl.u32 %v851_v6, 16  ;;  %v852_v8 = vand.u32 65535, %v851_v6 }
0x195c   :  { %v855_v9 = vcvt.s32.f32 %v853_v7  ;;  %v854_v10 = vcvt.s32.f32 %v852_v8 }
0x195e   :  { %858 = vadd.xlane.f32.xlu0 %v855_v9  ;;  %856 = vadd.xlane.f32.xlu1 %v854_v10 }
0x19eb   :  { %v859_v12 = vpop.xlane.xlu0 %858  ;;  %v857_v13 = vpop.xlane.xlu1 %856 }
0x19ec   :  { %v861_v15 = vcvt.f32.s32 %v859_v12  ;;  %v860_v20 = vcvt.f32.s32 %v857_v13 }
0x19ee   :  { %v862_v19 = vshll.u32 %v861_v15, 16 }
0x19f0   :  { %v863_v21 = vadd.s32 %v862_v19, %v860_v20 }
0x19f2   :  { %v864_v22 = vrot.slane %v863_v21, 4 }
0x19f4   :  { %v865_v23 = vadd.s32 %v864_v22, %v863_v21 }
0x19f6   :  { %v866_v24 = vrot.slane %v865_v23, 2 }
0x19f8   :  { %v867_v25 = vadd.s32 %v866_v24, %v865_v23 }
0x19fa   :  { %v868_v26 = vrot.slane %v867_v25, 1 }
0x19fc   :  { %v869_v27 = vadd.s32 %v868_v26, %v867_v25 }
0x19fe   :  { %1032 = vpush %v869_v27 }
0x1a2f   :  { %s1033_s16 = spop %1032 }
0x1a30   :  { %p871_p1 = scmp.ge.s32.totalorder %s1033_s16, 512 }
0x1a32   :  { %s1433_s15 = smov (!%p871_p1, %s845_s15), %s1431_s13 }
0x1a33   :  { %s873_s0 = sor.u32 1, %s1433_s15 }
0x1a34   :  { %v874_v28 = vstv %s873_s0 }
0x1a35   :  { %vm875_vm14 = vcmp.ge.s32.totalorder %v1102_v16, %v874_v28  ;;  %vm876_vm15 = vcmp.ge.s32.totalorder %v1106_v17, %v874_v28 }
0x1a36   :  { %v877_v29 = vsel %vm875_vm14, 1, %v1068_v18  ;;  %v878_v30 = vsel %vm876_vm15, 1, %v1068_v18 }
0x1a37   :  { %v879_v31 = vadd.s32 %v878_v30, %v877_v29 }
0x1a39   :  { %v881_v32 = vshrl.u32 %v879_v31, 16  ;;  %v880_v33 = vand.u32 65535, %v879_v31 }
0x1a3b   :  { %v883_v34 = vcvt.s32.f32 %v881_v32  ;;  %v882_v35 = vcvt.s32.f32 %v880_v33 }
0x1a3d   :  { %886 = vadd.xlane.f32.xlu0 %v883_v34  ;;  %884 = vadd.xlane.f32.xlu1 %v882_v35 }
0x1aca   :  { %v887_v36 = vpop.xlane.xlu0 %886  ;;  %v885_v37 = vpop.xlane.xlu1 %884 }
0x1acb   :  { %v889_v38 = vcvt.f32.s32 %v887_v36  ;;  %v888_v40 = vcvt.f32.s32 %v885_v37 }
0x1acd   :  { %v890_v39 = vshll.u32 %v889_v38, 16 }
0x1acf   :  { %v891_v41 = vadd.s32 %v890_v39, %v888_v40 }
0x1ad1   :  { %v892_v42 = vrot.slane %v891_v41, 4 }
0x1ad3   :  { %v893_v43 = vadd.s32 %v892_v42, %v891_v41 }
0x1ad5   :  { %v894_v44 = vrot.slane %v893_v43, 2 }
0x1ad7   :  { %v895_v45 = vadd.s32 %v894_v44, %v893_v43 }
0x1ad9   :  { %v896_v46 = vrot.slane %v895_v45, 1 }
0x1adb   :  { %v897_v47 = vadd.s32 %v896_v46, %v895_v45 }
0x1add   :  { %1034 = vpush %v897_v47 }
0x1b0e   :  { %s1035_s1 = spop %1034 }
0x1b0f   :  { %p899_p2 = scmp.ge.s32.totalorder %s1035_s1, 512 }
0x1b11   :  { %s1435_s0 = smov (!%p899_p2, %s873_s0), %s1433_s15 }
0x1b12   :  { %v901_v48 = vstv %s1435_s0 }
0x1b13   :  { %vm902_vm0 = vcmp.gt.s32.totalorder %v1102_v16, %v901_v48  ;;  %vm903_vm1 = vcmp.gt.s32.totalorder %v1106_v17, %v901_v48  ;;  %vm938_vm2 = vcmp.eq.s32.totalorder %v1102_v16, %v901_v48  ;;  %vm939_vm3 = vcmp.eq.s32.totalorder %v1106_v17, %v901_v48 }
0x1b14   :  { %v904_v49 = vsel %vm902_vm0, 1, %v1068_v18  ;;  %v905_v50 = vsel %vm903_vm1, 1, %v1068_v18  ;;  %v926_v56 = vsel %vm902_vm0, %v1097_v11, 0.0  ;;  %v927_v57 = vsel %vm903_vm1, %v1099_v14, 0.0 }
0x1b15   :  { %v906_v51 = vadd.s32 %v905_v50, %v904_v49  ;;  %v940_v58 = vsel %vm938_vm2, %v1097_v11, 0.0  ;;  %v941_v59 = vsel %vm939_vm3, %v1099_v14, 0.0  ;;  %v928_v18 = vadd.f32 %v927_v57, %v926_v56 }
0x1b16   :  { %v942_v60 = vmax.f32 %v940_v58, %v941_v59 }
0x1b17   :  { %v908_v52 = vshrl.u32 %v906_v51, 16  ;;  %v907_v53 = vand.u32 65535, %v906_v51 }
0x1b19   :  { %v910_v54 = vcvt.s32.f32 %v908_v52  ;;  %v909_v55 = vcvt.s32.f32 %v907_v53 }
0x1b1b   :  { %913 = vadd.xlane.f32.xlu0 %v910_v54  ;;  %911 = vadd.xlane.f32.xlu1 %v909_v55 }
0x1b1f   :  { %929 = vadd.xlane.f32.xlu0 %v928_v18  ;;  %943 = vmax.xlane.f32.xlu1 %v942_v60 }
0x1ba8   :  { %v914_v61 = vpop.xlane.xlu0 %913  ;;  %v912_v16 = vpop.xlane.xlu1 %911 }
0x1ba9   :  { %v916_v62 = vcvt.f32.s32 %v914_v61  ;;  %v915_v63 = vcvt.f32.s32 %v912_v16 }
0x1bab   :  { %v917_v17 = vshll.u32 %v916_v62, 16 }
0x1bac   :  { %v930_v0 = vpop.xlane.xlu0 %929  ;;  %v944_v1 = vpop.xlane.xlu1 %943 }
0x1bad   :  { %v918_v2 = vadd.s32 %v917_v17, %v915_v63  ;;  %v931_v3 = vrot.slane %v930_v0, 4  ;;  %v945_v4 = vrot.slane %v944_v1, 4 }
0x1baf   :  { %v919_v5 = vrot.slane %v918_v2, 4  ;;  %v932_v11 = vadd.f32 %v931_v3, %v930_v0  ;;  %v946_v6 = vmax.f32 %v944_v1, %v945_v4 }
0x1bb1   :  { %v920_v14 = vadd.s32 %v919_v5, %v918_v2  ;;  %v933_v7 = vrot.slane %v932_v11, 2  ;;  %v947_v8 = vrot.slane %v946_v6, 2 }
0x1bb3   :  { %v934_v9 = vadd.f32 %v933_v7, %v932_v11  ;;  %v948_v10 = vmax.f32 %v946_v6, %v947_v8  ;;  %v921_v12 = vrot.slane %v920_v14, 2 }
0x1bb5   :  { %v922_v13 = vadd.s32 %v921_v12, %v920_v14  ;;  %v935_v15 = vrot.slane %v934_v9, 1  ;;  %v949_v20 = vrot.slane %v948_v10, 1 }
0x1bb7   :  { %v923_v19 = vrot.slane %v922_v13, 1  ;;  %v936_v22 = vadd.f32 %v935_v15, %v934_v9  ;;  %v950_v23 = vmax.f32 %v948_v10, %v949_v20 }
0x1bb9   :  { %v924_v21 = vadd.s32 %v923_v19, %v922_v13 }
0x1bbb   :  { %1036 = vpush %v924_v21 }
0x1bbc   :  { %1038 = vpush %v936_v22 }
0x1bbd   :  { %1040 = vpush %v950_v23 }
0x1bec   :  { %s1037_s17 = spop %1036 }
0x1bed   :  { %s952_s18 = ssub.s32 512, %s1037_s17  ;;  %s1039_s19 = spop %1038 }
0x1bee   :  { %s953_s20 = scvt.s32.f32 %s952_s18  ;;  %s1041_s21 = spop %1040 }
0x1bf0   :  { %s954_s22 = smul.f32 %s1041_s21, %s953_s20 }
0x1bf2   :  { %s955_s23 = sadd.f32 %s1039_s19, %s954_s22 }
0x1bf4   :  { %s956_s26 = smul.f32 0.001953125, %s955_s23 }
0x1bf6   :  { %v957_v24 = vstv %s956_s26 }
0x1bf7   :  { %959 = vst [vmem:[#allocation2] sm:$0x1] %v957_v24 }
0x1bf8   :  { %1055 = shalt.err (!%p1052_p7)
}
0x1bf9   :  { %s1056_s3 = scalar_lea.hbm %s1375_s2, 16 }
0x1bfa   :  { %p1057_p8 = scmp.ne.s32.totalorder %s1375_s2, %s1056_s3  ;;  %p1060_p9 = scmp.lt.u32.totalorder %s1056_s3, %s1375_s2 }
0x1bfc   :  { %p1062_p10 = pnand %p1060_p9, %p1057_p8 }
0x1bfe   :  { %1065 = shalt.err (!%p1062_p10)
}
0x1bff   :  { %969 = dma.vmem_to_hbm [thread:$0]  %s967_s25, 16, %s1375_s2, [#allocation3]  }
0x1c00   :  { %1066 = dma.done.wait [#allocation3], 16  }
0x1c01   :  { %1067 = vsyncadd [#allocation3], 4294967280 }
0x1c02   :  { %973 = vsyncpa [#allocation3], 1 }

</bundles_post_ra>
